<compile_context>
chip_gen: v7x
topology: tpu7x:2x2x1
jax: 0.10.0
libtpu: 0.0.40
codegen_flags: <defaults>
</compile_context>

<pallas_src>
import functools

import jax
import jax.numpy as jnp
from jax import lax
from jax.experimental import pallas as pl
from jax.experimental.pallas import tpu as pltpu

# ---- small TPU-aligned config (stand-in for BERT-base 768/12/12/3072) ----
VOCAB = 64
TYPE_VOCAB = 2
MAX_POS = 32
HIDDEN = 128
NUM_HEADS = 4
HEAD_DIM = HIDDEN // NUM_HEADS
INTER = 256
NUM_LAYERS = 2
NUM_CLASSES = 3
CLS_PAD = 128          # pad classifier output to a full lane-width slab
LN_EPS = 1e-12


# ---------------------------------------------------------------- helpers ----
def _ln(x, g, b, eps):
    mean = jnp.mean(x, axis=-1, keepdims=True)
    cen = x - mean
    var = jnp.mean(cen * cen, axis=-1, keepdims=True)
    return cen * lax.rsqrt(var + eps) * g + b


def _gelu(x):
    # TODO(synk): reference BERT uses erf-based GELU; tanh approximation used here.
    c = 0.7978845608028654  # sqrt(2/pi)
    return 0.5 * x * (1.0 + jnp.tanh(c * (x + 0.044715 * x * x * x)))


# ----------------------------------------------------------------- kernel ----
def _encoder_kernel(mask_ref, emb_ref, eg_ref, eb_ref,
                    wqkv_ref, bqkv_ref, wo_ref, bo_ref, ln1g_ref, ln1b_ref,
                    wi_ref, bi_ref, wf_ref, bf_ref, ln2g_ref, ln2b_ref,
                    pw_ref, pb_ref, fw_ref, fb_ref,
                    logits_ref, h_sc, *, num_heads, head_dim, eps):
    """grid = (batch, layer); activation stays resident in VMEM scratch."""
    l = pl.program_id(1)
    H = num_heads * head_dim

    # --- layer 0: fuse the embedding LayerNorm, seed the resident activation ---
    @pl.when(l == 0)
    def _():
        h_sc[...] = _ln(emb_ref[0], eg_ref[...], eb_ref[...], eps)

    h = h_sc[...]                                          # (S, H) f32
    add_mask = mask_ref[0]                                 # (1, S) additive, f32
    scale = 1.0 / float(head_dim) ** 0.5

    # --- fused QKV projection (bf16 weights, bf16 activations, f32 acc) ---
    h_bf = h.astype(jnp.bfloat16)
    qkv = jnp.dot(h_bf, wqkv_ref[0],
                  preferred_element_type=jnp.float32) + bqkv_ref[0]   # (S, 3H)
    q = qkv[:, :H]
    k = qkv[:, H:2 * H]
    v = qkv[:, 2 * H:]

    # --- per-head attention; concat folded into the output projection:
    #     attn = sum_h softmax(q_h k_h^T / sqrt(d) + mask) v_h @ wo[h] ---
    wo = wo_ref[0]                                         # (H, H) bf16
    attn = jnp.zeros((h.shape[0], H), jnp.float32)
    for i in range(num_heads):                             # small, fully unrolled
        sl = slice(i * head_dim, (i + 1) * head_dim)
        qh = q[:, sl].astype(jnp.bfloat16)
        kh = k[:, sl].astype(jnp.bfloat16)
        vh = v[:, sl].astype(jnp.bfloat16)
        s = lax.dot_general(qh, kh, (((1,), (1,)), ((), ())),
                            preferred_element_type=jnp.float32)       # (S, S)
        s = s * scale + add_mask
        s = s - jnp.max(s, axis=-1, keepdims=True)
        p = jnp.exp(s)
        p = p * pl.reciprocal(jnp.sum(p, axis=-1, keepdims=True), approx=True)
        ctx = jnp.dot(p.astype(jnp.bfloat16), vh,
                      preferred_element_type=jnp.float32)             # (S, d)
        attn = attn + jnp.dot(ctx.astype(jnp.bfloat16), wo[sl, :],
                              preferred_element_type=jnp.float32)     # (S, H)
    attn = attn + bo_ref[0]
    h1 = _ln(attn + h, ln1g_ref[0], ln1b_ref[0], eps)

    # --- FFN: up-proj + GELU + down-proj + add & LayerNorm ---
    inter = jnp.dot(h1.astype(jnp.bfloat16), wi_ref[0],
                    preferred_element_type=jnp.float32) + bi_ref[0]
    inter = _gelu(inter)
    ffn = jnp.dot(inter.astype(jnp.bfloat16), wf_ref[0],
                  preferred_element_type=jnp.float32) + bf_ref[0]
    h_new = _ln(ffn + h1, ln2g_ref[0], ln2b_ref[0], eps)
    h_sc[...] = h_new                                       # carry to next layer

    # --- last layer: pooler (tanh) on [CLS] + padded classifier, lane-dense ---
    @pl.when(l == pl.num_programs(1) - 1)
    def _():
        cls = h_new[0:1, :].astype(jnp.bfloat16)             # (1, H)
        pooled = jnp.tanh(jnp.dot(cls, pw_ref[...],
                                  preferred_element_type=jnp.float32)
                          + pb_ref[...])                     # (1, H) f32
        logits_ref[0] = (jnp.dot(pooled.astype(jnp.bfloat16), fw_ref[...],
                                 preferred_element_type=jnp.float32)
                         + fb_ref[...]).astype(logits_ref.dtype)


def bert_encoder(emb, add_mask, p):
    """emb: (B, S, H) f32 pre-LN embedding sum; returns padded logits (B, 1, 128)."""
    B, S, H = emb.shape
    L = NUM_LAYERS
    lay = lambda arr: pl.BlockSpec((1,) + arr.shape[1:],
                                   lambda b, l: (l, 0, 0))            # per-layer
    const = lambda arr: pl.BlockSpec(arr.shape, lambda b, l: (0, 0))  # shared
    return pl.pallas_call(
        functools.partial(_encoder_kernel, num_heads=NUM_HEADS,
                          head_dim=HEAD_DIM, eps=LN_EPS),
        grid=(B, L),
        out_shape=jax.ShapeDtypeStruct((B, 1, CLS_PAD), jnp.float32),
        in_specs=[
            pl.BlockSpec((1, 1, S), lambda b, l: (b, 0, 0)),   # additive mask (B,1,S)
            pl.BlockSpec((1, S, H), lambda b, l: (b, 0, 0)),   # pre-LN embeddings
            const(p["emb_ln_g"]), const(p["emb_ln_b"]),
            lay(p["wqkv"]), lay(p["bqkv"]),
            lay(p["wo"]), lay(p["bo"]),
            lay(p["ln1_g"]), lay(p["ln1_b"]),
            lay(p["wi"]), lay(p["bi"]),
            lay(p["wf"]), lay(p["bf"]),
            lay(p["ln2_g"]), lay(p["ln2_b"]),
            const(p["pool_w"]), const(p["pool_b"]),
            const(p["fc_w_pad"]), const(p["fc_b_pad"]),
        ],
        out_specs=pl.BlockSpec((1, 1, CLS_PAD), lambda b, l: (b, 0, 0)),
        scratch_shapes=[pltpu.VMEM((S, H), jnp.float32)],     # resident activation
        compiler_params=pltpu.CompilerParams(
            dimension_semantics=("parallel", "arbitrary")),
    )(add_mask, emb, p["emb_ln_g"], p["emb_ln_b"],
      p["wqkv"], p["bqkv"], p["wo"], p["bo"], p["ln1_g"], p["ln1_b"],
      p["wi"], p["bi"], p["wf"], p["bf"], p["ln2_g"], p["ln2_b"],
      p["pool_w"], p["pool_b"], p["fc_w_pad"], p["fc_b_pad"])


# ----------------------------------------------------------------- params ----
def init_params(key):
    keys = iter(jax.random.split(key, 16))

    def nrm(shape, dtype=jnp.float32):
        return (0.02 * jax.random.normal(next(keys), shape, jnp.float32)).astype(dtype)

    ones = lambda shape: jnp.ones(shape, jnp.float32)
    zeros = lambda shape: jnp.zeros(shape, jnp.float32)

    # classifier padded to 128 output lanes (lane-dense store); true logits = cols [:3]
    fc_w = nrm((HIDDEN, NUM_CLASSES))
    fc_w_pad = jnp.zeros((HIDDEN, CLS_PAD), jnp.float32).at[:, :NUM_CLASSES].set(fc_w)

    L = NUM_LAYERS
    return {
        # embeddings stay f32 (gathered + summed in XLA)
        "word_emb": nrm((VOCAB, HIDDEN)),
        "pos_emb": nrm((MAX_POS, HIDDEN)),
        "type_emb": nrm((TYPE_VOCAB, HIDDEN)),
        "emb_ln_g": ones((1, HIDDEN)),
        "emb_ln_b": zeros((1, HIDDEN)),
        # per-layer weights stacked along a leading layer axis; MXU operands in bf16
        "wqkv": nrm((L, HIDDEN, 3 * HIDDEN), jnp.bfloat16),
        "bqkv": zeros((L, 1, 3 * HIDDEN)),
        "wo": nrm((L, HIDDEN, HIDDEN), jnp.bfloat16),
        "bo": zeros((L, 1, HIDDEN)),
        "ln1_g": ones((L, 1, HIDDEN)),
        "ln1_b": zeros((L, 1, HIDDEN)),
        "wi": nrm((L, HIDDEN, INTER), jnp.bfloat16),
        "bi": zeros((L, 1, INTER)),
        "wf": nrm((L, INTER, HIDDEN), jnp.bfloat16),
        "bf": zeros((L, 1, HIDDEN)),
        "ln2_g": ones((L, 1, HIDDEN)),
        "ln2_b": zeros((L, 1, HIDDEN)),
        # pooler + classifier (bf16 matmul operands, f32 biases)
        "pool_w": nrm((HIDDEN, HIDDEN), jnp.bfloat16),
        "pool_b": zeros((1, HIDDEN)),
        "fc_w_pad": fc_w_pad.astype(jnp.bfloat16),
        "fc_b_pad": zeros((1, CLS_PAD)),
    }


# ---------------------------------------------------------------- forward ----
def model_forward(params, input_ids, input_mask, segment_ids):
    B, S = input_ids.shape

    # --- embeddings (gathers are XLA glue; their LayerNorm is fused in-kernel) ---
    word = jnp.take(params["word_emb"], input_ids, axis=0)
    pos = params["pos_emb"][:S][None, :, :]
    tok = jnp.take(params["type_emb"], segment_ids, axis=0)
    emb = word + pos + tok                                        # (B, S, H) f32

    # --- additive attention mask kept tiny: (B, 1, S), broadcast in-kernel ---
    add_mask = ((1.0 - input_mask.astype(jnp.float32)) * -10000.0).reshape(B, 1, S)

    # --- single fused encoder kernel: all layers + pooler + classifier ---
    logits_pad = bert_encoder(emb, add_mask, params)              # (B, 1, 128)
    return logits_pad.reshape(B, CLS_PAD)[:, :NUM_CLASSES]        # (B, 3)


# -------------------------------------------------------------------- main ----
if __name__ == "__main__":
    B, S = 2, 16
    root = jax.random.PRNGKey(0)
    k_param, k_ids, k_seg = jax.random.split(root, 3)

    params = init_params(k_param)

    input_ids = jax.random.randint(k_ids, (B, S), 0, VOCAB, dtype=jnp.int32)
    # valid tokens = 1; pad the tail of the second sequence
    input_mask = jnp.concatenate(
        [jnp.ones((1, S), jnp.int32),
         jnp.concatenate([jnp.ones((1, S - 4), jnp.int32),
                          jnp.zeros((1, 4), jnp.int32)], axis=1)], axis=0)
    segment_ids = jax.random.randint(k_seg, (B, S), 0, TYPE_VOCAB, dtype=jnp.int32)

    fwd = jax.jit(model_forward)
    logits = fwd(params, input_ids, input_mask, segment_ids)
    logits = jax.block_until_ready(logits)
    assert logits.shape == (B, NUM_CLASSES) and logits.dtype == jnp.float32
    assert bool(jnp.all(jnp.isfinite(logits)))
    print("KERNEL_OK")
</pallas_src>

<mosaic_0001>
module attributes {stable_mosaic.version = 11 : i64} {
  func.func @_encoder_kernel(%arg0: i32, %arg1: i32, %arg2: memref<1x1x16xf32, #tpu.memory_space<vmem>>, %arg3: memref<1x16x128xf32, #tpu.memory_space<vmem>>, %arg4: memref<1x128xf32, #tpu.memory_space<vmem>>, %arg5: memref<1x128xf32, #tpu.memory_space<vmem>>, %arg6: memref<1x128x384xbf16, #tpu.memory_space<vmem>>, %arg7: memref<1x1x384xf32, #tpu.memory_space<vmem>>, %arg8: memref<1x128x128xbf16, #tpu.memory_space<vmem>>, %arg9: memref<1x1x128xf32, #tpu.memory_space<vmem>>, %arg10: memref<1x1x128xf32, #tpu.memory_space<vmem>>, %arg11: memref<1x1x128xf32, #tpu.memory_space<vmem>>, %arg12: memref<1x128x256xbf16, #tpu.memory_space<vmem>>, %arg13: memref<1x1x256xf32, #tpu.memory_space<vmem>>, %arg14: memref<1x256x128xbf16, #tpu.memory_space<vmem>>, %arg15: memref<1x1x128xf32, #tpu.memory_space<vmem>>, %arg16: memref<1x1x128xf32, #tpu.memory_space<vmem>>, %arg17: memref<1x1x128xf32, #tpu.memory_space<vmem>>, %arg18: memref<128x128xbf16, #tpu.memory_space<vmem>>, %arg19: memref<1x128xf32, #tpu.memory_space<vmem>>, %arg20: memref<128x128xbf16, #tpu.memory_space<vmem>>, %arg21: memref<1x128xf32, #tpu.memory_space<vmem>>, %arg22: memref<1x1x128xf32, #tpu.memory_space<vmem>>, %arg23: memref<16x128xf32, #tpu.memory_space<vmem>>) attributes {dimension_semantics = [#tpu.dimension_semantics<parallel>, #tpu.dimension_semantics<arbitrary>], iteration_bounds = array<i64: 2, 2>, scalar_prefetch = 0 : i64, scratch_operands = 1 : i64, tpu.core_type = #tpu.core_type<tc>, window_params = [{transform_indices = @transform_0, window_bounds = array<i64: 1, 1, 16>}, {transform_indices = @transform_1, window_bounds = array<i64: 1, 16, 128>}, {pipeline_mode = #tpu.pipeline_mode<synchronous>, transform_indices = @transform_2, window_bounds = array<i64: 1, 128>}, {pipeline_mode = #tpu.pipeline_mode<synchronous>, transform_indices = @transform_3, window_bounds = array<i64: 1, 128>}, {transform_indices = @transform_4, window_bounds = array<i64: 1, 128, 384>}, {transform_indices = @transform_5, window_bounds = array<i64: 1, 1, 384>}, {transform_indices = @transform_6, window_bounds = array<i64: 1, 128, 128>}, {transform_indices = @transform_7, window_bounds = array<i64: 1, 1, 128>}, {transform_indices = @transform_8, window_bounds = array<i64: 1, 1, 128>}, {transform_indices = @transform_9, window_bounds = array<i64: 1, 1, 128>}, {transform_indices = @transform_10, window_bounds = array<i64: 1, 128, 256>}, {transform_indices = @transform_11, window_bounds = array<i64: 1, 1, 256>}, {transform_indices = @transform_12, window_bounds = array<i64: 1, 256, 128>}, {transform_indices = @transform_13, window_bounds = array<i64: 1, 1, 128>}, {transform_indices = @transform_14, window_bounds = array<i64: 1, 1, 128>}, {transform_indices = @transform_15, window_bounds = array<i64: 1, 1, 128>}, {pipeline_mode = #tpu.pipeline_mode<synchronous>, transform_indices = @transform_16, window_bounds = array<i64: 128, 128>}, {pipeline_mode = #tpu.pipeline_mode<synchronous>, transform_indices = @transform_17, window_bounds = array<i64: 1, 128>}, {pipeline_mode = #tpu.pipeline_mode<synchronous>, transform_indices = @transform_18, window_bounds = array<i64: 128, 128>}, {pipeline_mode = #tpu.pipeline_mode<synchronous>, transform_indices = @transform_19, window_bounds = array<i64: 1, 128>}, {transform_indices = @transform_20, window_bounds = array<i64: 1, 1, 128>}]} {
    %c0_i32 = arith.constant 0 : i32
    %0 = arith.cmpi eq, %arg1, %c0_i32 : i32
    %1 = arith.extui %0 : i1 to i32
    %c0_i32_0 = arith.constant 0 : i32
    %2 = arith.cmpi ne, %1, %c0_i32_0 : i32
    scf.if %2 {
      %c0_85 = arith.constant 0 : index
      %c0_86 = arith.constant 0 : index
      %c0_87 = arith.constant 0 : index
      %215 = vector.load %arg3[%c0_85, %c0_86, %c0_87] : memref<1x16x128xf32, #tpu.memory_space<vmem>>, vector<1x16x128xf32>
      %216 = vector.shape_cast %215 : vector<1x16x128xf32> to vector<16x128xf32>
      %c0_88 = arith.constant 0 : index
      %c0_89 = arith.constant 0 : index
      %217 = vector.load %arg4[%c0_88, %c0_89] : memref<1x128xf32, #tpu.memory_space<vmem>>, vector<1x128xf32>
      %c0_90 = arith.constant 0 : index
      %c0_91 = arith.constant 0 : index
      %218 = vector.load %arg5[%c0_90, %c0_91] : memref<1x128xf32, #tpu.memory_space<vmem>>, vector<1x128xf32>
      %cst_92 = arith.constant dense<0.000000e+00> : vector<16xf32>
      %219 = vector.multi_reduction <add>, %216, %cst_92 [1] : vector<16x128xf32> to vector<16xf32>
      %220 = vector.shape_cast %219 : vector<16xf32> to vector<16x1xf32>
      %cst_93 = arith.constant 1.280000e+02 : f32
      %221 = vector.broadcast %cst_93 : f32 to vector<16x1xf32>
      %222 = arith.divf %220, %221 : vector<16x1xf32>
      %223 = vector.broadcast %222 : vector<16x1xf32> to vector<16x128xf32>
      %224 = arith.subf %216, %223 : vector<16x128xf32>
      %225 = arith.mulf %224, %224 : vector<16x128xf32>
      %cst_94 = arith.constant dense<0.000000e+00> : vector<16xf32>
      %226 = vector.multi_reduction <add>, %225, %cst_94 [1] : vector<16x128xf32> to vector<16xf32>
      %227 = vector.shape_cast %226 : vector<16xf32> to vector<16x1xf32>
      %cst_95 = arith.constant 1.280000e+02 : f32
      %228 = vector.broadcast %cst_95 : f32 to vector<16x1xf32>
      %229 = arith.divf %227, %228 : vector<16x1xf32>
      %cst_96 = arith.constant 9.99999996E-13 : f32
      %230 = vector.broadcast %cst_96 : f32 to vector<16x1xf32>
      %231 = arith.addf %229, %230 : vector<16x1xf32>
      %232 = math.rsqrt %231 : vector<16x1xf32>
      %233 = vector.broadcast %232 : vector<16x1xf32> to vector<16x128xf32>
      %234 = arith.mulf %224, %233 : vector<16x128xf32>
      %235 = vector.broadcast %217 : vector<1x128xf32> to vector<16x128xf32>
      %236 = arith.mulf %234, %235 : vector<16x128xf32>
      %237 = vector.broadcast %218 : vector<1x128xf32> to vector<16x128xf32>
      %238 = arith.addf %236, %237 : vector<16x128xf32>
      %c0_97 = arith.constant 0 : index
      %c0_98 = arith.constant 0 : index
      %239 = vector.load %arg23[%c0_97, %c0_98] : memref<16x128xf32, #tpu.memory_space<vmem>>, vector<16x128xf32>
      tpu.vector_store %arg23[%c0_97, %c0_98], %238 {strides = array<i32>} : memref<16x128xf32, #tpu.memory_space<vmem>>, vector<16x128xf32>,
    } else {
    }
    %c0 = arith.constant 0 : index
    %c0_1 = arith.constant 0 : index
    %3 = vector.load %arg23[%c0, %c0_1] : memref<16x128xf32, #tpu.memory_space<vmem>>, vector<16x128xf32>
    %c0_2 = arith.constant 0 : index
    %c0_3 = arith.constant 0 : index
    %c0_4 = arith.constant 0 : index
    %4 = vector.load %arg2[%c0_2, %c0_3, %c0_4] : memref<1x1x16xf32, #tpu.memory_space<vmem>>, vector<1x1x16xf32>
    %5 = vector.shape_cast %4 : vector<1x1x16xf32> to vector<1x16xf32>
    %6 = arith.truncf %3 : vector<16x128xf32> to vector<16x128xbf16>
    %c0_5 = arith.constant 0 : index
    %c0_6 = arith.constant 0 : index
    %c0_7 = arith.constant 0 : index
    %7 = vector.load %arg6[%c0_5, %c0_6, %c0_7] : memref<1x128x384xbf16, #tpu.memory_space<vmem>>, vector<1x128x384xbf16>
    %8 = vector.shape_cast %7 : vector<1x128x384xbf16> to vector<128x384xbf16>
    %cst = arith.constant dense<0.000000e+00> : vector<16x384xf32>
    %9 = tpu.matmul %6, %8, %cst {dimension_numbers = #tpu.dot_dimension_numbers<[1], [0], [0], [1], [0, 0, 1, 1], [], []>} : vector<16x128xbf16>, vector<128x384xbf16>, vector<16x384xf32> -> vector<16x384xf32>
    %c0_8 = arith.constant 0 : index
    %c0_9 = arith.constant 0 : index
    %c0_10 = arith.constant 0 : index
    %10 = vector.load %arg7[%c0_8, %c0_9, %c0_10] : memref<1x1x384xf32, #tpu.memory_space<vmem>>, vector<1x1x384xf32>
    %11 = vector.shape_cast %10 : vector<1x1x384xf32> to vector<1x384xf32>
    %12 = vector.broadcast %11 : vector<1x384xf32> to vector<16x384xf32>
    %13 = arith.addf %9, %12 : vector<16x384xf32>
    %14 = vector.extract_strided_slice %13 {offsets = [0, 0], sizes = [16, 128], strides = [1, 1]} : vector<16x384xf32> to vector<16x128xf32>
    %15 = vector.extract_strided_slice %13 {offsets = [0, 128], sizes = [16, 128], strides = [1, 1]} : vector<16x384xf32> to vector<16x128xf32>
    %16 = vector.extract_strided_slice %13 {offsets = [0, 256], sizes = [16, 128], strides = [1, 1]} : vector<16x384xf32> to vector<16x128xf32>
    %c0_11 = arith.constant 0 : index
    %c0_12 = arith.constant 0 : index
    %c0_13 = arith.constant 0 : index
    %17 = vector.load %arg8[%c0_11, %c0_12, %c0_13] : memref<1x128x128xbf16, #tpu.memory_space<vmem>>, vector<1x128x128xbf16>
    %18 = vector.shape_cast %17 : vector<1x128x128xbf16> to vector<128x128xbf16>
    %cst_14 = arith.constant 0.000000e+00 : f32
    %19 = vector.broadcast %cst_14 : f32 to vector<16x128xf32>
    %20 = vector.extract_strided_slice %14 {offsets = [0, 0], sizes = [16, 32], strides = [1, 1]} : vector<16x128xf32> to vector<16x32xf32>
    %21 = arith.truncf %20 : vector<16x32xf32> to vector<16x32xbf16>
    %22 = vector.extract_strided_slice %15 {offsets = [0, 0], sizes = [16, 32], strides = [1, 1]} : vector<16x128xf32> to vector<16x32xf32>
    %23 = arith.truncf %22 : vector<16x32xf32> to vector<16x32xbf16>
    %24 = vector.extract_strided_slice %16 {offsets = [0, 0], sizes = [16, 32], strides = [1, 1]} : vector<16x128xf32> to vector<16x32xf32>
    %25 = arith.truncf %24 : vector<16x32xf32> to vector<16x32xbf16>
    %cst_15 = arith.constant dense<0.000000e+00> : vector<16x16xf32>
    %26 = tpu.matmul %21, %23, %cst_15 {dimension_numbers = #tpu.dot_dimension_numbers<[1], [1], [0], [0], [0, 0, 1, 0], [], []>} : vector<16x32xbf16>, vector<16x32xbf16>, vector<16x16xf32> -> vector<16x16xf32>
    %cst_16 = arith.constant 0.176776692 : f32
    %27 = vector.broadcast %cst_16 : f32 to vector<16x16xf32>
    %28 = arith.mulf %26, %27 : vector<16x16xf32>
    %29 = vector.broadcast %5 : vector<1x16xf32> to vector<16x16xf32>
    %30 = arith.addf %28, %29 : vector<16x16xf32>
    %cst_17 = arith.constant dense<0xFF800000> : vector<16xf32>
    %31 = vector.multi_reduction <maximumf>, %30, %cst_17 [1] : vector<16x16xf32> to vector<16xf32>
    %32 = vector.shape_cast %31 : vector<16xf32> to vector<16x1xf32>
    %33 = vector.broadcast %32 : vector<16x1xf32> to vector<16x16xf32>
    %34 = arith.subf %30, %33 : vector<16x16xf32>
    %35 = math.exp %34 : vector<16x16xf32>
    %cst_18 = arith.constant dense<0.000000e+00> : vector<16xf32>
    %36 = vector.multi_reduction <add>, %35, %cst_18 [1] : vector<16x16xf32> to vector<16xf32>
    %37 = vector.shape_cast %36 : vector<16xf32> to vector<16x1xf32>
    %38 = tpu.reciprocal %37 {approx = true} : vector<16x1xf32> -> vector<16x1xf32>
    %39 = vector.broadcast %38 : vector<16x1xf32> to vector<16x16xf32>
    %40 = arith.mulf %35, %39 : vector<16x16xf32>
    %41 = arith.truncf %40 : vector<16x16xf32> to vector<16x16xbf16>
    %cst_19 = arith.constant dense<0.000000e+00> : vector<16x32xf32>
    %42 = tpu.matmul %41, %25, %cst_19 {dimension_numbers = #tpu.dot_dimension_numbers<[1], [0], [0], [1], [0, 0, 1, 1], [], []>} : vector<16x16xbf16>, vector<16x32xbf16>, vector<16x32xf32> -> vector<16x32xf32>
    %43 = arith.truncf %42 : vector<16x32xf32> to vector<16x32xbf16>
    %44 = vector.extract_strided_slice %18 {offsets = [0, 0], sizes = [32, 128], strides = [1, 1]} : vector<128x128xbf16> to vector<32x128xbf16>
    %cst_20 = arith.constant dense<0.000000e+00> : vector<16x128xf32>
    %45 = tpu.matmul %43, %44, %cst_20 {dimension_numbers = #tpu.dot_dimension_numbers<[1], [0], [0], [1], [0, 0, 1, 1], [], []>} : vector<16x32xbf16>, vector<32x128xbf16>, vector<16x128xf32> -> vector<16x128xf32>
    %46 = arith.addf %19, %45 : vector<16x128xf32>
    %47 = vector.extract_strided_slice %14 {offsets = [0, 32], sizes = [16, 32], strides = [1, 1]} : vector<16x128xf32> to vector<16x32xf32>
    %48 = arith.truncf %47 : vector<16x32xf32> to vector<16x32xbf16>
    %49 = vector.extract_strided_slice %15 {offsets = [0, 32], sizes = [16, 32], strides = [1, 1]} : vector<16x128xf32> to vector<16x32xf32>
    %50 = arith.truncf %49 : vector<16x32xf32> to vector<16x32xbf16>
    %51 = vector.extract_strided_slice %16 {offsets = [0, 32], sizes = [16, 32], strides = [1, 1]} : vector<16x128xf32> to vector<16x32xf32>
    %52 = arith.truncf %51 : vector<16x32xf32> to vector<16x32xbf16>
    %cst_21 = arith.constant dense<0.000000e+00> : vector<16x16xf32>
    %53 = tpu.matmul %48, %50, %cst_21 {dimension_numbers = #tpu.dot_dimension_numbers<[1], [1], [0], [0], [0, 0, 1, 0], [], []>} : vector<16x32xbf16>, vector<16x32xbf16>, vector<16x16xf32> -> vector<16x16xf32>
    %cst_22 = arith.constant 0.176776692 : f32
    %54 = vector.broadcast %cst_22 : f32 to vector<16x16xf32>
    %55 = arith.mulf %53, %54 : vector<16x16xf32>
    %56 = vector.broadcast %5 : vector<1x16xf32> to vector<16x16xf32>
    %57 = arith.addf %55, %56 : vector<16x16xf32>
    %cst_23 = arith.constant dense<0xFF800000> : vector<16xf32>
    %58 = vector.multi_reduction <maximumf>, %57, %cst_23 [1] : vector<16x16xf32> to vector<16xf32>
    %59 = vector.shape_cast %58 : vector<16xf32> to vector<16x1xf32>
    %60 = vector.broadcast %59 : vector<16x1xf32> to vector<16x16xf32>
    %61 = arith.subf %57, %60 : vector<16x16xf32>
    %62 = math.exp %61 : vector<16x16xf32>
    %cst_24 = arith.constant dense<0.000000e+00> : vector<16xf32>
    %63 = vector.multi_reduction <add>, %62, %cst_24 [1] : vector<16x16xf32> to vector<16xf32>
    %64 = vector.shape_cast %63 : vector<16xf32> to vector<16x1xf32>
    %65 = tpu.reciprocal %64 {approx = true} : vector<16x1xf32> -> vector<16x1xf32>
    %66 = vector.broadcast %65 : vector<16x1xf32> to vector<16x16xf32>
    %67 = arith.mulf %62, %66 : vector<16x16xf32>
    %68 = arith.truncf %67 : vector<16x16xf32> to vector<16x16xbf16>
    %cst_25 = arith.constant dense<0.000000e+00> : vector<16x32xf32>
    %69 = tpu.matmul %68, %52, %cst_25 {dimension_numbers = #tpu.dot_dimension_numbers<[1], [0], [0], [1], [0, 0, 1, 1], [], []>} : vector<16x16xbf16>, vector<16x32xbf16>, vector<16x32xf32> -> vector<16x32xf32>
    %70 = arith.truncf %69 : vector<16x32xf32> to vector<16x32xbf16>
    %71 = vector.extract_strided_slice %18 {offsets = [32, 0], sizes = [32, 128], strides = [1, 1]} : vector<128x128xbf16> to vector<32x128xbf16>
    %cst_26 = arith.constant dense<0.000000e+00> : vector<16x128xf32>
    %72 = tpu.matmul %70, %71, %cst_26 {dimension_numbers = #tpu.dot_dimension_numbers<[1], [0], [0], [1], [0, 0, 1, 1], [], []>} : vector<16x32xbf16>, vector<32x128xbf16>, vector<16x128xf32> -> vector<16x128xf32>
    %73 = arith.addf %46, %72 : vector<16x128xf32>
    %74 = vector.extract_strided_slice %14 {offsets = [0, 64], sizes = [16, 32], strides = [1, 1]} : vector<16x128xf32> to vector<16x32xf32>
    %75 = arith.truncf %74 : vector<16x32xf32> to vector<16x32xbf16>
    %76 = vector.extract_strided_slice %15 {offsets = [0, 64], sizes = [16, 32], strides = [1, 1]} : vector<16x128xf32> to vector<16x32xf32>
    %77 = arith.truncf %76 : vector<16x32xf32> to vector<16x32xbf16>
    %78 = vector.extract_strided_slice %16 {offsets = [0, 64], sizes = [16, 32], strides = [1, 1]} : vector<16x128xf32> to vector<16x32xf32>
    %79 = arith.truncf %78 : vector<16x32xf32> to vector<16x32xbf16>
    %cst_27 = arith.constant dense<0.000000e+00> : vector<16x16xf32>
    %80 = tpu.matmul %75, %77, %cst_27 {dimension_numbers = #tpu.dot_dimension_numbers<[1], [1], [0], [0], [0, 0, 1, 0], [], []>} : vector<16x32xbf16>, vector<16x32xbf16>, vector<16x16xf32> -> vector<16x16xf32>
    %cst_28 = arith.constant 0.176776692 : f32
    %81 = vector.broadcast %cst_28 : f32 to vector<16x16xf32>
    %82 = arith.mulf %80, %81 : vector<16x16xf32>
    %83 = vector.broadcast %5 : vector<1x16xf32> to vector<16x16xf32>
    %84 = arith.addf %82, %83 : vector<16x16xf32>
    %cst_29 = arith.constant dense<0xFF800000> : vector<16xf32>
    %85 = vector.multi_reduction <maximumf>, %84, %cst_29 [1] : vector<16x16xf32> to vector<16xf32>
    %86 = vector.shape_cast %85 : vector<16xf32> to vector<16x1xf32>
    %87 = vector.broadcast %86 : vector<16x1xf32> to vector<16x16xf32>
    %88 = arith.subf %84, %87 : vector<16x16xf32>
    %89 = math.exp %88 : vector<16x16xf32>
    %cst_30 = arith.constant dense<0.000000e+00> : vector<16xf32>
    %90 = vector.multi_reduction <add>, %89, %cst_30 [1] : vector<16x16xf32> to vector<16xf32>
    %91 = vector.shape_cast %90 : vector<16xf32> to vector<16x1xf32>
    %92 = tpu.reciprocal %91 {approx = true} : vector<16x1xf32> -> vector<16x1xf32>
    %93 = vector.broadcast %92 : vector<16x1xf32> to vector<16x16xf32>
    %94 = arith.mulf %89, %93 : vector<16x16xf32>
    %95 = arith.truncf %94 : vector<16x16xf32> to vector<16x16xbf16>
    %cst_31 = arith.constant dense<0.000000e+00> : vector<16x32xf32>
    %96 = tpu.matmul %95, %79, %cst_31 {dimension_numbers = #tpu.dot_dimension_numbers<[1], [0], [0], [1], [0, 0, 1, 1], [], []>} : vector<16x16xbf16>, vector<16x32xbf16>, vector<16x32xf32> -> vector<16x32xf32>
    %97 = arith.truncf %96 : vector<16x32xf32> to vector<16x32xbf16>
    %98 = vector.extract_strided_slice %18 {offsets = [64, 0], sizes = [32, 128], strides = [1, 1]} : vector<128x128xbf16> to vector<32x128xbf16>
    %cst_32 = arith.constant dense<0.000000e+00> : vector<16x128xf32>
    %99 = tpu.matmul %97, %98, %cst_32 {dimension_numbers = #tpu.dot_dimension_numbers<[1], [0], [0], [1], [0, 0, 1, 1], [], []>} : vector<16x32xbf16>, vector<32x128xbf16>, vector<16x128xf32> -> vector<16x128xf32>
    %100 = arith.addf %73, %99 : vector<16x128xf32>
    %101 = vector.extract_strided_slice %14 {offsets = [0, 96], sizes = [16, 32], strides = [1, 1]} : vector<16x128xf32> to vector<16x32xf32>
    %102 = arith.truncf %101 : vector<16x32xf32> to vector<16x32xbf16>
    %103 = vector.extract_strided_slice %15 {offsets = [0, 96], sizes = [16, 32], strides = [1, 1]} : vector<16x128xf32> to vector<16x32xf32>
    %104 = arith.truncf %103 : vector<16x32xf32> to vector<16x32xbf16>
    %105 = vector.extract_strided_slice %16 {offsets = [0, 96], sizes = [16, 32], strides = [1, 1]} : vector<16x128xf32> to vector<16x32xf32>
    %106 = arith.truncf %105 : vector<16x32xf32> to vector<16x32xbf16>
    %cst_33 = arith.constant dense<0.000000e+00> : vector<16x16xf32>
    %107 = tpu.matmul %102, %104, %cst_33 {dimension_numbers = #tpu.dot_dimension_numbers<[1], [1], [0], [0], [0, 0, 1, 0], [], []>} : vector<16x32xbf16>, vector<16x32xbf16>, vector<16x16xf32> -> vector<16x16xf32>
    %cst_34 = arith.constant 0.176776692 : f32
    %108 = vector.broadcast %cst_34 : f32 to vector<16x16xf32>
    %109 = arith.mulf %107, %108 : vector<16x16xf32>
    %110 = vector.broadcast %5 : vector<1x16xf32> to vector<16x16xf32>
    %111 = arith.addf %109, %110 : vector<16x16xf32>
    %cst_35 = arith.constant dense<0xFF800000> : vector<16xf32>
    %112 = vector.multi_reduction <maximumf>, %111, %cst_35 [1] : vector<16x16xf32> to vector<16xf32>
    %113 = vector.shape_cast %112 : vector<16xf32> to vector<16x1xf32>
    %114 = vector.broadcast %113 : vector<16x1xf32> to vector<16x16xf32>
    %115 = arith.subf %111, %114 : vector<16x16xf32>
    %116 = math.exp %115 : vector<16x16xf32>
    %cst_36 = arith.constant dense<0.000000e+00> : vector<16xf32>
    %117 = vector.multi_reduction <add>, %116, %cst_36 [1] : vector<16x16xf32> to vector<16xf32>
    %118 = vector.shape_cast %117 : vector<16xf32> to vector<16x1xf32>
    %119 = tpu.reciprocal %118 {approx = true} : vector<16x1xf32> -> vector<16x1xf32>
    %120 = vector.broadcast %119 : vector<16x1xf32> to vector<16x16xf32>
    %121 = arith.mulf %116, %120 : vector<16x16xf32>
    %122 = arith.truncf %121 : vector<16x16xf32> to vector<16x16xbf16>
    %cst_37 = arith.constant dense<0.000000e+00> : vector<16x32xf32>
    %123 = tpu.matmul %122, %106, %cst_37 {dimension_numbers = #tpu.dot_dimension_numbers<[1], [0], [0], [1], [0, 0, 1, 1], [], []>} : vector<16x16xbf16>, vector<16x32xbf16>, vector<16x32xf32> -> vector<16x32xf32>
    %124 = arith.truncf %123 : vector<16x32xf32> to vector<16x32xbf16>
    %125 = vector.extract_strided_slice %18 {offsets = [96, 0], sizes = [32, 128], strides = [1, 1]} : vector<128x128xbf16> to vector<32x128xbf16>
    %cst_38 = arith.constant dense<0.000000e+00> : vector<16x128xf32>
    %126 = tpu.matmul %124, %125, %cst_38 {dimension_numbers = #tpu.dot_dimension_numbers<[1], [0], [0], [1], [0, 0, 1, 1], [], []>} : vector<16x32xbf16>, vector<32x128xbf16>, vector<16x128xf32> -> vector<16x128xf32>
    %127 = arith.addf %100, %126 : vector<16x128xf32>
    %c0_39 = arith.constant 0 : index
    %c0_40 = arith.constant 0 : index
    %c0_41 = arith.constant 0 : index
    %128 = vector.load %arg9[%c0_39, %c0_40, %c0_41] : memref<1x1x128xf32, #tpu.memory_space<vmem>>, vector<1x1x128xf32>
    %129 = vector.shape_cast %128 : vector<1x1x128xf32> to vector<1x128xf32>
    %130 = vector.broadcast %129 : vector<1x128xf32> to vector<16x128xf32>
    %131 = arith.addf %127, %130 : vector<16x128xf32>
    %132 = arith.addf %131, %3 : vector<16x128xf32>
    %c0_42 = arith.constant 0 : index
    %c0_43 = arith.constant 0 : index
    %c0_44 = arith.constant 0 : index
    %133 = vector.load %arg10[%c0_42, %c0_43, %c0_44] : memref<1x1x128xf32, #tpu.memory_space<vmem>>, vector<1x1x128xf32>
    %134 = vector.shape_cast %133 : vector<1x1x128xf32> to vector<1x128xf32>
    %c0_45 = arith.constant 0 : index
    %c0_46 = arith.constant 0 : index
    %c0_47 = arith.constant 0 : index
    %135 = vector.load %arg11[%c0_45, %c0_46, %c0_47] : memref<1x1x128xf32, #tpu.memory_space<vmem>>, vector<1x1x128xf32>
    %136 = vector.shape_cast %135 : vector<1x1x128xf32> to vector<1x128xf32>
    %cst_48 = arith.constant dense<0.000000e+00> : vector<16xf32>
    %137 = vector.multi_reduction <add>, %132, %cst_48 [1] : vector<16x128xf32> to vector<16xf32>
    %138 = vector.shape_cast %137 : vector<16xf32> to vector<16x1xf32>
    %cst_49 = arith.constant 1.280000e+02 : f32
    %139 = vector.broadcast %cst_49 : f32 to vector<16x1xf32>
    %140 = arith.divf %138, %139 : vector<16x1xf32>
    %141 = vector.broadcast %140 : vector<16x1xf32> to vector<16x128xf32>
    %142 = arith.subf %132, %141 : vector<16x128xf32>
    %143 = arith.mulf %142, %142 : vector<16x128xf32>
    %cst_50 = arith.constant dense<0.000000e+00> : vector<16xf32>
    %144 = vector.multi_reduction <add>, %143, %cst_50 [1] : vector<16x128xf32> to vector<16xf32>
    %145 = vector.shape_cast %144 : vector<16xf32> to vector<16x1xf32>
    %cst_51 = arith.constant 1.280000e+02 : f32
    %146 = vector.broadcast %cst_51 : f32 to vector<16x1xf32>
    %147 = arith.divf %145, %146 : vector<16x1xf32>
    %cst_52 = arith.constant 9.99999996E-13 : f32
    %148 = vector.broadcast %cst_52 : f32 to vector<16x1xf32>
    %149 = arith.addf %147, %148 : vector<16x1xf32>
    %150 = math.rsqrt %149 : vector<16x1xf32>
    %151 = vector.broadcast %150 : vector<16x1xf32> to vector<16x128xf32>
    %152 = arith.mulf %142, %151 : vector<16x128xf32>
    %153 = vector.broadcast %134 : vector<1x128xf32> to vector<16x128xf32>
    %154 = arith.mulf %152, %153 : vector<16x128xf32>
    %155 = vector.broadcast %136 : vector<1x128xf32> to vector<16x128xf32>
    %156 = arith.addf %154, %155 : vector<16x128xf32>
    %157 = arith.truncf %156 : vector<16x128xf32> to vector<16x128xbf16>
    %c0_53 = arith.constant 0 : index
    %c0_54 = arith.constant 0 : index
    %c0_55 = arith.constant 0 : index
    %158 = vector.load %arg12[%c0_53, %c0_54, %c0_55] : memref<1x128x256xbf16, #tpu.memory_space<vmem>>, vector<1x128x256xbf16>
    %159 = vector.shape_cast %158 : vector<1x128x256xbf16> to vector<128x256xbf16>
    %cst_56 = arith.constant dense<0.000000e+00> : vector<16x256xf32>
    %160 = tpu.matmul %157, %159, %cst_56 {dimension_numbers = #tpu.dot_dimension_numbers<[1], [0], [0], [1], [0, 0, 1, 1], [], []>} : vector<16x128xbf16>, vector<128x256xbf16>, vector<16x256xf32> -> vector<16x256xf32>
    %c0_57 = arith.constant 0 : index
    %c0_58 = arith.constant 0 : index
    %c0_59 = arith.constant 0 : index
    %161 = vector.load %arg13[%c0_57, %c0_58, %c0_59] : memref<1x1x256xf32, #tpu.memory_space<vmem>>, vector<1x1x256xf32>
    %162 = vector.shape_cast %161 : vector<1x1x256xf32> to vector<1x256xf32>
    %163 = vector.broadcast %162 : vector<1x256xf32> to vector<16x256xf32>
    %164 = arith.addf %160, %163 : vector<16x256xf32>
    %cst_60 = arith.constant 5.000000e-01 : f32
    %165 = vector.broadcast %cst_60 : f32 to vector<16x256xf32>
    %166 = arith.mulf %165, %164 : vector<16x256xf32>
    %cst_61 = arith.constant 4.471500e-02 : f32
    %167 = vector.broadcast %cst_61 : f32 to vector<16x256xf32>
    %168 = arith.mulf %167, %164 : vector<16x256xf32>
    %169 = arith.mulf %168, %164 : vector<16x256xf32>
    %170 = arith.mulf %169, %164 : vector<16x256xf32>
    %171 = arith.addf %164, %170 : vector<16x256xf32>
    %cst_62 = arith.constant 0.797884583 : f32
    %172 = vector.broadcast %cst_62 : f32 to vector<16x256xf32>
    %173 = arith.mulf %172, %171 : vector<16x256xf32>
    %174 = math.tanh %173 : vector<16x256xf32>
    %cst_63 = arith.constant 1.000000e+00 : f32
    %175 = vector.broadcast %cst_63 : f32 to vector<16x256xf32>
    %176 = arith.addf %175, %174 : vector<16x256xf32>
    %177 = arith.mulf %166, %176 : vector<16x256xf32>
    %178 = arith.truncf %177 : vector<16x256xf32> to vector<16x256xbf16>
    %c0_64 = arith.constant 0 : index
    %c0_65 = arith.constant 0 : index
    %c0_66 = arith.constant 0 : index
    %179 = vector.load %arg14[%c0_64, %c0_65, %c0_66] : memref<1x256x128xbf16, #tpu.memory_space<vmem>>, vector<1x256x128xbf16>
    %180 = vector.shape_cast %179 : vector<1x256x128xbf16> to vector<256x128xbf16>
    %cst_67 = arith.constant dense<0.000000e+00> : vector<16x128xf32>
    %181 = tpu.matmul %178, %180, %cst_67 {dimension_numbers = #tpu.dot_dimension_numbers<[1], [0], [0], [1], [0, 0, 1, 1], [], []>} : vector<16x256xbf16>, vector<256x128xbf16>, vector<16x128xf32> -> vector<16x128xf32>
    %c0_68 = arith.constant 0 : index
    %c0_69 = arith.constant 0 : index
    %c0_70 = arith.constant 0 : index
    %182 = vector.load %arg15[%c0_68, %c0_69, %c0_70] : memref<1x1x128xf32, #tpu.memory_space<vmem>>, vector<1x1x128xf32>
    %183 = vector.shape_cast %182 : vector<1x1x128xf32> to vector<1x128xf32>
    %184 = vector.broadcast %183 : vector<1x128xf32> to vector<16x128xf32>
    %185 = arith.addf %181, %184 : vector<16x128xf32>
    %186 = arith.addf %185, %156 : vector<16x128xf32>
    %c0_71 = arith.constant 0 : index
    %c0_72 = arith.constant 0 : index
    %c0_73 = arith.constant 0 : index
    %187 = vector.load %arg16[%c0_71, %c0_72, %c0_73] : memref<1x1x128xf32, #tpu.memory_space<vmem>>, vector<1x1x128xf32>
    %188 = vector.shape_cast %187 : vector<1x1x128xf32> to vector<1x128xf32>
    %c0_74 = arith.constant 0 : index
    %c0_75 = arith.constant 0 : index
    %c0_76 = arith.constant 0 : index
    %189 = vector.load %arg17[%c0_74, %c0_75, %c0_76] : memref<1x1x128xf32, #tpu.memory_space<vmem>>, vector<1x1x128xf32>
    %190 = vector.shape_cast %189 : vector<1x1x128xf32> to vector<1x128xf32>
    %cst_77 = arith.constant dense<0.000000e+00> : vector<16xf32>
    %191 = vector.multi_reduction <add>, %186, %cst_77 [1] : vector<16x128xf32> to vector<16xf32>
    %192 = vector.shape_cast %191 : vector<16xf32> to vector<16x1xf32>
    %cst_78 = arith.constant 1.280000e+02 : f32
    %193 = vector.broadcast %cst_78 : f32 to vector<16x1xf32>
    %194 = arith.divf %192, %193 : vector<16x1xf32>
    %195 = vector.broadcast %194 : vector<16x1xf32> to vector<16x128xf32>
    %196 = arith.subf %186, %195 : vector<16x128xf32>
    %197 = arith.mulf %196, %196 : vector<16x128xf32>
    %cst_79 = arith.constant dense<0.000000e+00> : vector<16xf32>
    %198 = vector.multi_reduction <add>, %197, %cst_79 [1] : vector<16x128xf32> to vector<16xf32>
    %199 = vector.shape_cast %198 : vector<16xf32> to vector<16x1xf32>
    %cst_80 = arith.constant 1.280000e+02 : f32
    %200 = vector.broadcast %cst_80 : f32 to vector<16x1xf32>
    %201 = arith.divf %199, %200 : vector<16x1xf32>
    %cst_81 = arith.constant 9.99999996E-13 : f32
    %202 = vector.broadcast %cst_81 : f32 to vector<16x1xf32>
    %203 = arith.addf %201, %202 : vector<16x1xf32>
    %204 = math.rsqrt %203 : vector<16x1xf32>
    %205 = vector.broadcast %204 : vector<16x1xf32> to vector<16x128xf32>
    %206 = arith.mulf %196, %205 : vector<16x128xf32>
    %207 = vector.broadcast %188 : vector<1x128xf32> to vector<16x128xf32>
    %208 = arith.mulf %206, %207 : vector<16x128xf32>
    %209 = vector.broadcast %190 : vector<1x128xf32> to vector<16x128xf32>
    %210 = arith.addf %208, %209 : vector<16x128xf32>
    %c0_82 = arith.constant 0 : index
    %c0_83 = arith.constant 0 : index
    %211 = vector.load %arg23[%c0_82, %c0_83] : memref<16x128xf32, #tpu.memory_space<vmem>>, vector<16x128xf32>
    tpu.vector_store %arg23[%c0_82, %c0_83], %210 {strides = array<i32>} : memref<16x128xf32, #tpu.memory_space<vmem>>, vector<16x128xf32>,
    %c1_i32 = arith.constant 1 : i32
    %212 = arith.cmpi eq, %arg1, %c1_i32 : i32
    %213 = arith.extui %212 : i1 to i32
    %c0_i32_84 = arith.constant 0 : i32
    %214 = arith.cmpi ne, %213, %c0_i32_84 : i32
    scf.if %214 {
      %215 = vector.extract_strided_slice %210 {offsets = [0, 0], sizes = [1, 128], strides = [1, 1]} : vector<16x128xf32> to vector<1x128xf32>
      %216 = arith.truncf %215 : vector<1x128xf32> to vector<1x128xbf16>
      %c0_85 = arith.constant 0 : index
      %c0_86 = arith.constant 0 : index
      %217 = vector.load %arg18[%c0_85, %c0_86] : memref<128x128xbf16, #tpu.memory_space<vmem>>, vector<128x128xbf16>
      %cst_87 = arith.constant dense<0.000000e+00> : vector<1x128xf32>
      %218 = tpu.matmul %216, %217, %cst_87 {dimension_numbers = #tpu.dot_dimension_numbers<[1], [0], [0], [1], [0, 0, 1, 1], [], []>} : vector<1x128xbf16>, vector<128x128xbf16>, vector<1x128xf32> -> vector<1x128xf32>
      %c0_88 = arith.constant 0 : index
      %c0_89 = arith.constant 0 : index
      %219 = vector.load %arg19[%c0_88, %c0_89] : memref<1x128xf32, #tpu.memory_space<vmem>>, vector<1x128xf32>
      %220 = arith.addf %218, %219 : vector<1x128xf32>
      %221 = math.tanh %220 : vector<1x128xf32>
      %222 = arith.truncf %221 : vector<1x128xf32> to vector<1x128xbf16>
      %c0_90 = arith.constant 0 : index
      %c0_91 = arith.constant 0 : index
      %223 = vector.load %arg20[%c0_90, %c0_91] : memref<128x128xbf16, #tpu.memory_space<vmem>>, vector<128x128xbf16>
      %cst_92 = arith.constant dense<0.000000e+00> : vector<1x128xf32>
      %224 = tpu.matmul %222, %223, %cst_92 {dimension_numbers = #tpu.dot_dimension_numbers<[1], [0], [0], [1], [0, 0, 1, 1], [], []>} : vector<1x128xbf16>, vector<128x128xbf16>, vector<1x128xf32> -> vector<1x128xf32>
      %c0_93 = arith.constant 0 : index
      %c0_94 = arith.constant 0 : index
      %225 = vector.load %arg21[%c0_93, %c0_94] : memref<1x128xf32, #tpu.memory_space<vmem>>, vector<1x128xf32>
      %226 = arith.addf %224, %225 : vector<1x128xf32>
      %c0_95 = arith.constant 0 : index
      %c0_96 = arith.constant 0 : index
      %c0_97 = arith.constant 0 : index
      %227 = vector.load %arg22[%c0_95, %c0_96, %c0_97] : memref<1x1x128xf32, #tpu.memory_space<vmem>>, vector<1x1x128xf32>
      %228 = vector.shape_cast %227 : vector<1x1x128xf32> to vector<1x128xf32>
      %229 = vector.shape_cast %226 : vector<1x128xf32> to vector<1x1x128xf32>
      tpu.vector_store %arg22[%c0_95, %c0_96, %c0_97], %229 {strides = array<i32>} : memref<1x1x128xf32, #tpu.memory_space<vmem>>, vector<1x1x128xf32>,
    } else {
    }
    return
  }
  func.func @transform_0(%arg0: i32, %arg1: i32) -> (i32, i32, i32) {
    %c0_i32 = arith.constant 0 : i32
    %c0_i32_0 = arith.constant 0 : i32
    %c0_i32_1 = arith.constant 0 : i32
    return %arg0, %c0_i32, %c0_i32_0 : i32, i32, i32
  }
  func.func @transform_1(%arg0: i32, %arg1: i32) -> (i32, i32, i32) {
    %c0_i32 = arith.constant 0 : i32
    %c0_i32_0 = arith.constant 0 : i32
    %c0_i32_1 = arith.constant 0 : i32
    return %arg0, %c0_i32, %c0_i32_0 : i32, i32, i32
  }
  func.func @transform_2(%arg0: i32, %arg1: i32) -> (i32, i32) {
    %c0_i32 = arith.constant 0 : i32
    %c0_i32_0 = arith.constant 0 : i32
    %c0_i32_1 = arith.constant 0 : i32
    return %c0_i32, %c0_i32_0 : i32, i32
  }
  func.func @transform_3(%arg0: i32, %arg1: i32) -> (i32, i32) {
    %c0_i32 = arith.constant 0 : i32
    %c0_i32_0 = arith.constant 0 : i32
    %c0_i32_1 = arith.constant 0 : i32
    return %c0_i32, %c0_i32_0 : i32, i32
  }
  func.func @transform_4(%arg0: i32, %arg1: i32) -> (i32, i32, i32) {
    %c0_i32 = arith.constant 0 : i32
    %c0_i32_0 = arith.constant 0 : i32
    %c0_i32_1 = arith.constant 0 : i32
    return %arg1, %c0_i32, %c0_i32_0 : i32, i32, i32
  }
  func.func @transform_5(%arg0: i32, %arg1: i32) -> (i32, i32, i32) {
    %c0_i32 = arith.constant 0 : i32
    %c0_i32_0 = arith.constant 0 : i32
    %c0_i32_1 = arith.constant 0 : i32
    return %arg1, %c0_i32, %c0_i32_0 : i32, i32, i32
  }
  func.func @transform_6(%arg0: i32, %arg1: i32) -> (i32, i32, i32) {
    %c0_i32 = arith.constant 0 : i32
    %c0_i32_0 = arith.constant 0 : i32
    %c0_i32_1 = arith.constant 0 : i32
    return %arg1, %c0_i32, %c0_i32_0 : i32, i32, i32
  }
  func.func @transform_7(%arg0: i32, %arg1: i32) -> (i32, i32, i32) {
    %c0_i32 = arith.constant 0 : i32
    %c0_i32_0 = arith.constant 0 : i32
    %c0_i32_1 = arith.constant 0 : i32
    return %arg1, %c0_i32, %c0_i32_0 : i32, i32, i32
  }
  func.func @transform_8(%arg0: i32, %arg1: i32) -> (i32, i32, i32) {
    %c0_i32 = arith.constant 0 : i32
    %c0_i32_0 = arith.constant 0 : i32
    %c0_i32_1 = arith.constant 0 : i32
    return %arg1, %c0_i32, %c0_i32_0 : i32, i32, i32
  }
  func.func @transform_9(%arg0: i32, %arg1: i32) -> (i32, i32, i32) {
    %c0_i32 = arith.constant 0 : i32
    %c0_i32_0 = arith.constant 0 : i32
    %c0_i32_1 = arith.constant 0 : i32
    return %arg1, %c0_i32, %c0_i32_0 : i32, i32, i32
  }
  func.func @transform_10(%arg0: i32, %arg1: i32) -> (i32, i32, i32) {
    %c0_i32 = arith.constant 0 : i32
    %c0_i32_0 = arith.constant 0 : i32
    %c0_i32_1 = arith.constant 0 : i32
    return %arg1, %c0_i32, %c0_i32_0 : i32, i32, i32
  }
  func.func @transform_11(%arg0: i32, %arg1: i32) -> (i32, i32, i32) {
    %c0_i32 = arith.constant 0 : i32
    %c0_i32_0 = arith.constant 0 : i32
    %c0_i32_1 = arith.constant 0 : i32
    return %arg1, %c0_i32, %c0_i32_0 : i32, i32, i32
  }
  func.func @transform_12(%arg0: i32, %arg1: i32) -> (i32, i32, i32) {
    %c0_i32 = arith.constant 0 : i32
    %c0_i32_0 = arith.constant 0 : i32
    %c0_i32_1 = arith.constant 0 : i32
    return %arg1, %c0_i32, %c0_i32_0 : i32, i32, i32
  }
  func.func @transform_13(%arg0: i32, %arg1: i32) -> (i32, i32, i32) {
    %c0_i32 = arith.constant 0 : i32
    %c0_i32_0 = arith.constant 0 : i32
    %c0_i32_1 = arith.constant 0 : i32
    return %arg1, %c0_i32, %c0_i32_0 : i32, i32, i32
  }
  func.func @transform_14(%arg0: i32, %arg1: i32) -> (i32, i32, i32) {
    %c0_i32 = arith.constant 0 : i32
    %c0_i32_0 = arith.constant 0 : i32
    %c0_i32_1 = arith.constant 0 : i32
    return %arg1, %c0_i32, %c0_i32_0 : i32, i32, i32
  }
  func.func @transform_15(%arg0: i32, %arg1: i32) -> (i32, i32, i32) {
    %c0_i32 = arith.constant 0 : i32
    %c0_i32_0 = arith.constant 0 : i32
    %c0_i32_1 = arith.constant 0 : i32
    return %arg1, %c0_i32, %c0_i32_0 : i32, i32, i32
  }
  func.func @transform_16(%arg0: i32, %arg1: i32) -> (i32, i32) {
    %c0_i32 = arith.constant 0 : i32
    %c0_i32_0 = arith.constant 0 : i32
    %c0_i32_1 = arith.constant 0 : i32
    return %c0_i32, %c0_i32_0 : i32, i32
  }
  func.func @transform_17(%arg0: i32, %arg1: i32) -> (i32, i32) {
    %c0_i32 = arith.constant 0 : i32
    %c0_i32_0 = arith.constant 0 : i32
    %c0_i32_1 = arith.constant 0 : i32
    return %c0_i32, %c0_i32_0 : i32, i32
  }
  func.func @transform_18(%arg0: i32, %arg1: i32) -> (i32, i32) {
    %c0_i32 = arith.constant 0 : i32
    %c0_i32_0 = arith.constant 0 : i32
    %c0_i32_1 = arith.constant 0 : i32
    return %c0_i32, %c0_i32_0 : i32, i32
  }
  func.func @transform_19(%arg0: i32, %arg1: i32) -> (i32, i32) {
    %c0_i32 = arith.constant 0 : i32
    %c0_i32_0 = arith.constant 0 : i32
    %c0_i32_1 = arith.constant 0 : i32
    return %c0_i32, %c0_i32_0 : i32, i32
  }
  func.func @transform_20(%arg0: i32, %arg1: i32) -> (i32, i32, i32) {
    %c0_i32 = arith.constant 0 : i32
    %c0_i32_0 = arith.constant 0 : i32
    %c0_i32_1 = arith.constant 0 : i32
    return %arg0, %c0_i32, %c0_i32_0 : i32, i32, i32
  }
}

</mosaic_0001>

<bundles_post_ra>
// kernel: model_forward.1
= control target key start
LH: loop header
LB: loop body
LE: loop exit
PB: predicated region body
PF: predicated region fallthrough
CT: control target
= control target key end

     0   :  { %s4661_s0 = inlined_call_operand.vmem [shape: f32[2,1,16], index: 0, kind: input, shape index: {}]   ;;  %s4662_s1 = inlined_call_operand.vmem [shape: f32[2,16,128], index: 1, kind: input, shape index: {}]   ;;  %s4663_s2 = inlined_call_operand.vmem [shape: f32[1,128], index: 2, kind: input, shape index: {}]   ;;  %s4664_s3 = inlined_call_operand.vmem [shape: f32[1,128], index: 3, kind: input, shape index: {}]   ;;  %s4665_s4 = inlined_call_operand.vmem [shape: bf16[2,128,384], index: 4, kind: input, shape index: {}]   ;;  %s4666_s5 = inlined_call_operand.vmem [shape: f32[2,1,384], index: 5, kind: input, shape index: {}]   ;;  %s4667_s6 = inlined_call_operand.hbm [shape: bf16[2,128,128], index: 6, kind: input, shape index: {}]   ;;  %s4668_s7 = inlined_call_operand.vmem [shape: f32[2,1,128], index: 7, kind: input, shape index: {}]   ;;  %s4669_s8 = inlined_call_operand.vmem [shape: f32[2,1,128], index: 8, kind: input, shape index: {}]   ;;  %s4670_s9 = inlined_call_operand.vmem [shape: f32[2,1,128], index: 9, kind: input, shape index: {}]   ;;  %s4671_s10 = inlined_call_operand.vmem [shape: bf16[2,128,256], index: 10, kind: input, shape index: {}]   ;;  %s4672_s11 = inlined_call_operand.vmem [shape: f32[2,1,256], index: 11, kind: input, shape index: {}]   ;;  %s4673_s12 = inlined_call_operand.hbm [shape: bf16[2,256,128], index: 12, kind: input, shape index: {}]   ;;  %s4674_s13 = inlined_call_operand.vmem [shape: f32[2,1,128], index: 13, kind: input, shape index: {}]   ;;  %s4675_s14 = inlined_call_operand.vmem [shape: f32[2,1,128], index: 14, kind: input, shape index: {}]   ;;  %s4676_s15 = inlined_call_operand.hbm [shape: f32[2,1,128], index: 15, kind: input, shape index: {}]   ;;  %s4677_s16 = inlined_call_operand.vmem [shape: bf16[128,128], index: 16, kind: input, shape index: {}]   ;;  %s4678_s17 = inlined_call_operand.hbm [shape: f32[1,128], index: 17, kind: input, shape index: {}]   ;;  %s4679_s18 = inlined_call_operand.vmem [shape: bf16[128,128], index: 18, kind: input, shape index: {}]   ;;  %s4680_s19 = inlined_call_operand.vmem [shape: f32[1,128], index: 19, kind: input, shape index: {}]   ;;  %s4681_s20 = inlined_call_operand.hbm [shape: f32[2,1,128], index: 20, kind: output, shape index: {}]  }
   0x1   :  { %4711 = sst [smem:[#allocation31_spill]] %s4661_s0 }
   0x2   :  { %4712 = sst [smem:[#allocation32_spill]] %s4662_s1 }
   0x3   :  { %4713 = sst [smem:[#allocation33_spill]] %s4663_s2 }
   0x4   :  { %4714 = sst [smem:[#allocation34_spill]] %s4664_s3 }
   0x5   :  { %4715 = sst [smem:[#allocation35_spill]] %s4665_s4 }
   0x6   :  { %4716 = sst [smem:[#allocation36_spill]] %s4666_s5 }
   0x7   :  { %4717 = sst [smem:[#allocation37_spill]] %s4667_s6 }
   0x8   :  { %4718 = sst [smem:[#allocation38_spill]] %s4670_s9 }
   0x9   :  { %4719 = sst [smem:[#allocation39_spill]] %s4671_s10 }
   0xa   :  { %4720 = sst [smem:[#allocation40_spill]] %s4672_s11 }
   0xb   :  { %4721 = sst [smem:[#allocation41_spill]] %s4673_s12 }
   0xc   :  { %4722 = sst [smem:[#allocation42_spill]] %s4674_s13 }
   0xd   :  { %4723 = sst [smem:[#allocation43_spill]] %s4675_s14 }
   0xe   :  { %4724 = sst [smem:[#allocation44_spill]] %s4676_s15 }
   0xf   :  { %4725 = sst [smem:[#allocation45_spill]] %s4677_s16 }
  0x10   :  { %4726 = sst [smem:[#allocation46_spill]] %s4678_s17 }
  0x11   :  { %4727 = sst [smem:[#allocation47_spill]] %s4679_s18 }
  0x12   :  { %4728 = sst [smem:[#allocation48_spill]] %s4680_s19 }
  0x13   :  { %4729 = sst [smem:[#allocation49_spill]] %s4681_s20 }
  0x14   :  { %25 = vsyncpa [#allocation4], 0 }
  0x15   :  { %27 = vsyncpa [#allocation4 + $0x1], 0 }
  0x16   :  { %28 = vsyncpa [#allocation7], 0 }
  0x17   :  { %30 = vsyncpa [#allocation7 + $0x1], 0 }
  0x18   :  { %31 = vsyncpa [#allocation10], 0 }
  0x19   :  { %32 = vsyncpa [#allocation5], 0 }
  0x1a   :  { %34 = vsyncpa [#allocation5 + $0x1], 0  ;;  %s3929_s1 = smov 0   ;;  %s3931_s22 = smov 0  }
  0x1b   :  { %s3933_s23 = smov 0   ;;  %s3935_s24 = smov 0  }
  0x1c   :  { %s3937_s2 = smov 0   ;;  %s3939_s25 = smov 0  }
  0x1d   :  { %s3941_s3 = smov 0   ;;  %s3943_s26 = smov 0  }
  0x1e   :  { %s3945_s27 = smov 0   ;;  %s3947_s28 = smov 0  }
  0x1f   :  { %s3949_s4 = smov 0  }
  0x20 LB: > { %4730 = sst [smem:[#allocation16_spill]] %s3767_s1  ;;  %s49_s29 = sadd.s32 1, %s3799_s27  ;;  %s3807_s4 = sphi %s3949_s4, %s40_s4   ;;  %s3803_s28 = sphi %s3947_s28, %s4810_s28   ;;  %s3799_s27 = sphi %s3945_s27, %s4809_s27   ;;  %s3795_s26 = sphi %s3943_s26, %s4808_s26   ;;  %s3791_s3 = sphi %s3941_s3, %s4807_s3   ;;  %s3787_s25 = sphi %s3939_s25, %s4806_s25   ;;  %s3783_s2 = sphi %s3937_s2, %s4805_s2   ;;  %s3779_s24 = sphi %s3935_s24, %s4804_s24   ;;  %s3775_s23 = sphi %s3933_s23, %s4803_s23   ;;  %s3771_s22 = sphi %s3931_s22, %s4812_s22   ;;  %s3767_s1 = sphi %s3929_s1, %s4811_s1  }
  0x21   : > { %4731 = sst [smem:[#allocation17_spill]] %s3775_s23  ;;  %s205_s30 = sadd.s32 1, %s3787_s25 }
  0x22   : > { %4732 = sst [smem:[#allocation18_spill]] %s3783_s2  ;;  %p3986_p0 = scmp.ge.s32.totalorder %s49_s29, 2 }
  0x23   : > { %4733 = sst [smem:[#allocation19_spill]] %s3787_s25  ;;  %p212_p1 = scmp.ne.s32.totalorder %s3787_s25, %s3783_s2 }
  0x24   : > { %4734 = sst [smem:[#allocation20_spill]] %s3795_s26  ;;  %p213_p2 = scmp.eq.s32.totalorder %s3807_s4, 0 }
  0x25   : > { %4735 = sst [smem:[#allocation21_spill]] %s3799_s27  ;;  %s4814_s29 = smov (%p3986_p0, %s49_s29), 0 }
  0x26   : > { %4736 = sst [smem:[#allocation22_spill]] %s3803_s28  ;;  %p214_p3 = por %p213_p2, %p212_p1 }
  0x27   : > { %4737 = sst [smem:[#allocation23_spill]] %s3807_s4  ;;  %p3307_p4 = scmp.lt.s32.totalorder %s3807_s4, 4 }
  0x28   : > { %s4738_s0 = scalar_select %p3986_p0, 1, 0 }
  0x29   : > { %4739 = sst [smem:[#allocation24_spill]] %s4814_s29  ;;  %s202_s21 = ssub.s32 %s3799_s27, %s4814_s29 }
  0x2a   : > { %s4001_s20 = sand.u32 1, %s3787_s25   ;;  %p203_p5 = scmp.eq.s32.totalorder %s202_s21, 0 }
  0x2b   : > { %p4003_p6 = pnand %p3307_p4, %p214_p3  ;;  %s695_s16 = sand.u32 1, %s3807_s4  }
  0x2c   : > { %s4008_s18 = scalar_select %p203_p5, %s3787_s25, %s205_s30  }
  0x2d   : > { %s4740_s19 = scalar_select %p4003_p6, 1, 0 }
  0x2e   : > { %4741 = sst [smem:[#allocation25_spill]] %s4008_s18  ;;  %s2933_s14 = sshll.u32 %s4001_s20, 7 }
  0x2f   : > { %s3054_s13 = sshll.u32 %s3799_s27, 11  ;;  %s4742_s12 = sld [smem:[#allocation41_spill]] }
  0x30   : > { %s699_s21 = scalar_lea.vmem [#allocation6], %s2933_s14  ;;  %s4020_s5 = scalar_lea.sflag [#allocation7], %s695_s16 }
  0x31   : > { %s706_s29 = sshll.u32 %s699_s21, 4  ;;  %p4026_p8 = pneg %p4003_p6  ;;  %s4018_s29 = int_to_ptr.vmem [resolvable:$true] %s706_s29 }
  0x33   : > { %s4743_s18 = scalar_select %p4026_p8, 1, 0 }
  0x35   : > { %s4016_s9 = scalar_lea.hbm %s4742_s12, %s3054_s13  ;;  %s3564_s13 = scalar_lea.hbm %s4742_s12, 4096 }
  0x36   : > { %s3559_s30 = scalar_lea.hbm %s4016_s9, 2048  ;;  %p3565_p11 = scmp.lt.u32.totalorder %s4016_s9, %s4742_s12 }
  0x37   : > { %p3560_p7 = scmp.ne.s32.totalorder %s4016_s9, %s3559_s30  ;;  %p3566_p12 = scmp.lt.u32.totalorder %s3564_s13, %s3559_s30 }
  0x38   : > { %p3568_p1 = scmp.lt.u32.totalorder %s3559_s30, %s4016_s9 }
  0x39   : > { %p3562_p9 = pnand %p4026_p8, %p3560_p7  ;;  %p3567_p13 = por %p3566_p12, %p3565_p11 }
  0x3b   : > { %p3563_p10 = pneg %p3562_p9  ;;  %p3569_p2 = por %p3568_p1, %p3567_p13 }
  0x3d   : > { %p3570_p3 = pnand %p3569_p2, %p3563_p10 }
  0x3f   : > { %3573 = shalt.err (!%p3570_p3)
}
  0x40   : > { %s3574_s16 = scalar_lea.vmem %s4018_s29, 2048  ;;  %s3809_s10 = smov [#allocation6]  }
  0x41   : > { %p3575_p4 = scmp.ne.s32.totalorder %s4018_s29, %s3574_s16  ;;  %s3579_s11 = sshll.u32 %s3809_s10, 4  ;;  %s3580_s11 = int_to_ptr.vmem [resolvable:$false] %s3579_s11 }
  0x42   : > { %s3581_s14 = scalar_lea.vmem %s3580_s11, 4096  ;;  %p3582_p9 = scmp.lt.s32.totalorder %s4018_s29, %s3580_s11 }
  0x43   : > { %p3577_p5 = pnand %p3575_p4, %p4026_p8  ;;  %p3583_p0 = scmp.lt.s32.totalorder %s3581_s14, %s3574_s16 }
  0x45   : > { %p3578_p7 = pneg %p3577_p5  ;;  %p3584_p11 = por %p3583_p0, %p3582_p9 }
  0x47   : > { %p3585_p12 = pnand %p3584_p11, %p3578_p7 }
  0x49   : > { %3588 = shalt.err (!%p3585_p12)
}
  0x4a   : > { %s4687_s30 = smov 64   ;;  %s4688_s13 = smov 4  }
  0x4b   : > { %3298 = dma.hbm_to_vmem [thread:$0]  (!%p4003_p6), %s4016_s9, 2048, %s4018_s29, %s4020_s5, %s4687_s30, %s4687_s30, %s4688_s13  }
  0x4c   : > { %s4054_s21 = sadd.s32 4294967295, %s3807_s4   ;;  %s2926_s16 = sadd.s32 4294967294, %s3807_s4  }
  0x4d   : > { %s52_s10 = sadd.s32 1, %s3803_s28  ;;  %p4744_p0 = scmp.ne.s32.totalorder %s4738_s0, 0 }
  0x4e   : > { %p218_p10 = scmp.ne.s32.totalorder %s3783_s2, %s3779_s24  ;;  %p4699_p13 = scmp.eq.s32.totalorder %s4054_s21, 0 }
  0x4f   : > { %s4816_s10 = smov (!%p4744_p0, %s52_s10), %s3803_s28  ;;  %s549_s11 = sadd.s32 1, %s3775_s23 }
  0x50   : > { %p54_p1 = scmp.ge.s32.totalorder %s4816_s10, 2  ;;  %p4067_p2 = por %p4699_p13, %p218_p10 }
  0x51   : > { %p559_p3 = scmp.ne.s32.totalorder %s3775_s23, %s3771_s22  ;;  %p560_p4 = scmp.eq.s32.totalorder %s4054_s21, 3 }
  0x52   : > { %s4745_s14 = scalar_select %p4067_p2, 1, 0 }
  0x53   : > { %s4818_s10 = smov (%p54_p1, %s4816_s10), 0  ;;  %p565_p5 = scmp.ne.s32.totalorder %s3771_s22, %s3767_s1 }
  0x54   : > { %4746 = sst [smem:[#allocation26_spill]] %s4818_s10  ;;  %s546_s9 = ssub.s32 %s3803_s28, %s4818_s10 }
  0x55   : > { %p566_p7 = scmp.eq.s32.totalorder %s2926_s16, 3  ;;  %p547_p9 = scmp.eq.s32.totalorder %s546_s9, 0 }
  0x56   : > { %p4080_p11 = por %p560_p4, %p559_p3  ;;  %p2927_p0 = scmp.ge.s32.totalorder %s3807_s4, 1 }
  0x57   : > { %p4084_p12 = por %p566_p7, %p565_p5  ;;  %p573_p10 = scmp.lt.s32.totalorder %s3807_s4, 5 }
  0x58   : > { %s4747_s24 = scalar_select %p4080_p11, 1, 0 }
  0x59   : > { %s4749_s29 = scalar_select %p4084_p12, 1, 0 }
  0x5a   : > { %4748 = sst [smem:[#allocation27_spill]] %s4747_s24  ;;  %p4093_p1 = pnand %p2927_p0, %p573_p10 }
  0x5b   : > { %4750 = sst [smem:[#allocation28_spill]] %s4749_s29  ;;  %s3812_s16 = smov [#allocation9]  }
  0x5c   : > { %s4090_s0 = scalar_select %p547_p9, %s3775_s23, %s549_s11  }
  0x5d   : > { %s4752_s30 = scalar_select %p4093_p1, 1, 0 }
  0x5e   : > { %4751 = sst [smem:[#allocation29_spill]] %s4090_s0  ;;  %s595_s9 = sshll.u32 %s3812_s16, 4  ;;  %s596_s9 = int_to_ptr.vmem [resolvable:$true] %s595_s9 }
  0x5f   : > { %s2930_s13 = sshll.u32 %s4001_s20, 6  ;;  %p3288_p3 = pneg %p4093_p1 }
  0x60   : > { %s3053_s12 = sshll.u32 %s3799_s27, 10  ;;  %s645_s10 = scalar_lea.vmem [#allocation3], %s2930_s13 }
  0x61   : > { %s652_s28 = sshll.u32 %s645_s10, 4  ;;  %p4103_p4 = pnand %p3288_p3, %p4699_p13  ;;  %s4112_s28 = int_to_ptr.vmem [resolvable:$true] %s652_s28 }
  0x62   : > { %s4754_s6 = sld [smem:[#allocation37_spill]]  ;;  %s2936_s16 = sshll.u32 %s3799_s27, 4 }
  0x63   : > { %s4755_s17 = sld [smem:[#allocation46_spill]]  ;;  %p3591_p7 = pneg %p4103_p4 }
  0x68   : > { %s4110_s23 = scalar_lea.hbm %s4754_s6, %s3053_s12 }
  0x69   : > { %s3589_s4 = scalar_lea.hbm %s4755_s17, 16 }
  0x6a   : > { %p3590_p5 = scmp.ne.s32.totalorder %s4755_s17, %s3589_s4  ;;  %p3596_p10 = scmp.lt.u32.totalorder %s3589_s4, %s4755_s17 }
  0x6c   : > { %p3592_p9 = pnand %p3591_p7, %p3590_p5 }
  0x6e   : > { %p3593_p0 = pneg %p3592_p9 }
  0x70   : > { %p3598_p3 = pnand %p3596_p10, %p3593_p0 }
  0x72   : > { %3601 = shalt.err (!%p3598_p3)
}
  0x73   : > { %s3602_s12 = scalar_lea.vmem %s596_s9, 16  ;;  %s3609_s1 = scalar_lea.vmem %s596_s9, 32 }
  0x74   : > { %p3603_p13 = scmp.ne.s32.totalorder %s596_s9, %s3602_s12  ;;  %p3610_p2 = scmp.lt.s32.totalorder %s596_s9, %s596_s9 }
  0x75   : > { %p3611_p1 = scmp.lt.s32.totalorder %s3609_s1, %s3602_s12 }
  0x76   : > { %p3605_p12 = pnand %p3603_p13, %p3591_p7 }
  0x77   : > { %p3612_p6 = por %p3611_p1, %p3610_p2 }
  0x78   : > { %p3606_p11 = pneg %p3605_p12 }
  0x7a   : > { %p3613_p8 = pnand %p3612_p6, %p3606_p11 }
  0x7c   : > { %3616 = shalt.err (!%p3613_p8)
}
  0x7d   : > { %3291 = dma.hbm_to_vmem [thread:$0]  (!%p4103_p4), %s4755_s17, 16, %s596_s9, [#allocation10]  }
  0x7e   : > { %s642_s4 = scalar_lea.sflag [#allocation4], %s4001_s20  ;;  %s3617_s24 = scalar_lea.hbm %s4110_s23, 1024 }
  0x7f   : > { %p3618_p13 = scmp.ne.s32.totalorder %s4110_s23, %s3617_s24  ;;  %p4756_p12 = scmp.ne.s32.totalorder %s4743_s18, 0 }
  0x80   : > { %s3622_s25 = scalar_lea.hbm %s4754_s6, 2048  ;;  %p3623_p6 = scmp.lt.u32.totalorder %s4110_s23, %s4754_s6 }
  0x81   : > { %p3620_p5 = pnand %p3618_p13, %p4756_p12  ;;  %p3624_p8 = scmp.lt.u32.totalorder %s3622_s25, %s3617_s24 }
  0x82   : > { %p3626_p1 = scmp.lt.u32.totalorder %s3617_s24, %s4110_s23 }
  0x83   : > { %p3621_p2 = pneg %p3620_p5  ;;  %p3625_p11 = por %p3624_p8, %p3623_p6 }
  0x85   : > { %p3627_p7 = por %p3626_p1, %p3625_p11 }
  0x87   : > { %p3628_p9 = pnand %p3627_p7, %p3621_p2 }
  0x89   : > { %3631 = shalt.err (!%p3628_p9)
}
  0x8a   : > { %s3632_s9 = scalar_lea.vmem %s4112_s28, 1024  ;;  %s3813_s1 = smov [#allocation3]  }
  0x8b   : > { %p3633_p4 = scmp.ne.s32.totalorder %s4112_s28, %s3632_s9  ;;  %s3637_s29 = sshll.u32 %s3813_s1, 4  ;;  %s3638_s29 = int_to_ptr.vmem [resolvable:$false] %s3637_s29 }
  0x8c   : > { %s3639_s11 = scalar_lea.vmem %s3638_s29, 2048  ;;  %p3640_p3 = scmp.lt.s32.totalorder %s4112_s28, %s3638_s29 }
  0x8d   : > { %p3635_p0 = pnand %p3633_p4, %p4756_p12  ;;  %p3641_p13 = scmp.lt.s32.totalorder %s3639_s11, %s3632_s9 }
  0x8f   : > { %p3636_p10 = pneg %p3635_p0  ;;  %p3642_p5 = por %p3641_p13, %p3640_p3 }
  0x91   : > { %p3643_p6 = pnand %p3642_p5, %p3636_p10 }
  0x93   : > { %3646 = shalt.err (!%p3643_p6)
}
  0x94   : > { %p4757_p2 = scmp.ne.s32.totalorder %s4740_s19, 0  ;;  %s4758_s24 = smov 4  }
  0x95   : > { %s4759_s13 = smov 64   ;;  %s4760_s15 = sld [smem:[#allocation44_spill]] }
  0x96   : > { %3295 = dma.hbm_to_vmem [thread:$0]  (!%p4757_p2), %s4110_s23, 1024, %s4112_s28, %s642_s4, %s4759_s13, %s4759_s13, %s4758_s24  }
  0x97   : > { %s731_s12 = scalar_lea.vmem [#allocation8], %s4001_s20 }
  0x98   : > { %s738_s9 = sshll.u32 %s731_s12, 4  ;;  %s739_s9 = int_to_ptr.vmem [resolvable:$true] %s738_s9 }
  0x9b   : > { %s4163_s0 = scalar_lea.hbm %s4760_s15, %s2936_s16  ;;  %s3652_s28 = scalar_lea.hbm %s4760_s15, 32 }
  0x9c   : > { %s3647_s1 = scalar_lea.hbm %s4163_s0, 16  ;;  %p3653_p7 = scmp.lt.u32.totalorder %s4163_s0, %s4760_s15 }
  0x9d   : > { %p3648_p8 = scmp.ne.s32.totalorder %s4163_s0, %s3647_s1  ;;  %p3654_p9 = scmp.lt.u32.totalorder %s3652_s28, %s3647_s1 }
  0x9e   : > { %p3656_p0 = scmp.lt.u32.totalorder %s3647_s1, %s4163_s0 }
  0x9f   : > { %p3650_p11 = pnand %p3648_p8, %p4756_p12  ;;  %p3655_p4 = por %p3654_p9, %p3653_p7 }
  0xa1   : > { %p3651_p1 = pneg %p3650_p11  ;;  %p3657_p10 = por %p3656_p0, %p3655_p4 }
  0xa3   : > { %p3658_p3 = pnand %p3657_p10, %p3651_p1 }
  0xa5   : > { %3661 = shalt.err (!%p3658_p3)
}
  0xa6   : > { %s3662_s20 = scalar_lea.vmem %s739_s9, 16  ;;  %s3814_s16 = smov [#allocation8]  }
  0xa7   : > { %p3663_p13 = scmp.ne.s32.totalorder %s739_s9, %s3662_s20  ;;  %s3667_s24 = sshll.u32 %s3814_s16, 4  ;;  %s3668_s24 = int_to_ptr.vmem [resolvable:$false] %s3667_s24 }
  0xa8   : > { %s3669_s13 = scalar_lea.vmem %s3668_s24, 32  ;;  %p3670_p8 = scmp.lt.s32.totalorder %s739_s9, %s3668_s24 }
  0xa9   : > { %p3665_p5 = pnand %p3663_p13, %p4756_p12  ;;  %p3671_p11 = scmp.lt.s32.totalorder %s3669_s13, %s3662_s20 }
  0xab   : > { %p3666_p6 = pneg %p3665_p5  ;;  %p3672_p2 = por %p3671_p11, %p3670_p8 }
  0xad   : > { %p3673_p7 = pnand %p3672_p2, %p3666_p6 }
  0xaf   : > { %3676 = shalt.err (!%p3673_p7)
}
  0xb0   : > { %p4761_p9 = scmp.ne.s32.totalorder %s4740_s19, 0  ;;  %p4762_p1 = scmp.ne.s32.totalorder %s4752_s30, 0 }
  0xb2   : > { %3301 = dma.hbm_to_vmem [thread:$0]  (!%p4761_p9), %s4163_s0, 16, %s739_s9, %s4020_s5  }
  0xb3   : > { %747 = sbr.rel (%p4762_p1) target bundleno = 4738 (0x1282), region = 100 }
  0xba   : > { %s4187_s18 = sand.u32 1, %s3783_s2   ;;  %p4764_p12 = scmp.ne.s32.totalorder %s4745_s14, 0 }
  0xbb   : > { %4763 = sst [smem:[#allocation30_spill]] %s4187_s18  ;;  %s2938_s10 = sshll.u32 %s4187_s18, 6 }
  0xbc   : > { %s750_s25 = scalar_lea.sflag [#allocation4], %s4187_s18  ;;  %s4191_s12 = scalar_lea.vmem [#allocation3], %s2938_s10 }
  0xbd   : > { %3750 = dma.done.wait (%p4764_p12), %s750_s25, 1024  }
  0xbe   : > { %3752 = vsyncadd (%p4764_p12), %s750_s25, 4294966272  ;;  %s758_s5 = sand.u32 1, %s4054_s21   ;;  %s2939_s19 = sshll.u32 %s4187_s18, 7 }
  0xbf   : > { %s759_s30 = scalar_lea.sflag [#allocation7], %s758_s5  ;;  %s4199_s0 = scalar_lea.vmem [#allocation6], %s2939_s19 }
  0xc0   : > { %3754 = dma.done.wait (%p4764_p12), %s759_s30, 2064  }
  0xc1   : > { %3756 = vsyncadd (%p4764_p12), %s759_s30, 4294965232  ;;  %p4765_p2 = scmp.eq.s32.totalorder %s4054_s21, 0 }
  0xc3   : > { %3758 = dma.done.wait (%p4765_p2), [#allocation10], 16   ;;  %p4766_p4 = pmov %p4765_p2 }
  0xc4   : > { %p880_p0 = scmp.lt.s32.totalorder %s3795_s26, 1  ;;  %p888_p10 = scmp.lt.s32.totalorder %s3791_s3, 1 }
  0xc5   : > { %3760 = vsyncadd (%p4766_p4), [#allocation10], 4294967280  ;;  %s4768_s24 = sld [smem:[#allocation32_spill]]  ;;  %s4769_s9 = sld [smem:[#allocation35_spill]] }
  0xc6   : > { %s4214_s29 = scalar_select %p880_p0, %s3795_s26, 1 }
  0xc7   : > { %s4217_s14 = scalar_select %p888_p10, %s3791_s3, 1 }
  0xc8   : > { %s3055_s11 = sshll.u32 %s4214_s29, 4  ;;  %s4770_s27 = sld [smem:[#allocation36_spill]] }
  0xc9   : > { %s3274_s10 = smul.u32 192, %s4217_s14  ;;  %s3056_s5 = sshll.u32 %s4217_s14, 7 }
  0xca   : > { %s3275_s25 = smul.u32 3, %s4217_s14  ;;  %s2946_s19 = sshll.u32 %s4217_s14, 1 }
  0xcb   : > { %s887_s13 = scalar_lea.vmem %s4768_s24, %s3055_s11  ;;  %s4236_s1 = scalar_lea.vmem %s4769_s9, %s3274_s10 }
  0xcc   : > { %s4772_s23 = sld [smem:[#allocation39_spill]]  ;;  %s4773_s6 = sld [smem:[#allocation40_spill]] }
  0xcd   : > { %s4775_s11 = sld [smem:[#allocation43_spill]]  ;;  %s4776_s24 = sand.u32 1, %s3771_s22  }
  0xce   : > { %s4245_s20 = scalar_lea.vmem %s4770_s27, %s3275_s25  ;;  %s4774_s27 = sld [smem:[#allocation42_spill]] }
  0xcf   : > { %s4273_s2 = scalar_lea.vmem [#allocation11], %s4776_s24  ;;  %p2947_p3 = scmp.ne.s32.totalorder %s3791_s3, 0 }
  0xd0   : > { %v926_v0 = vld [vmem:[%s887_s13] sm:$0xff] (!%p2947_p3)  ;;  %v927_v1 = vld [vmem:[%s887_s13 + $0x8] sm:$0xff] (!%p2947_p3)  ;;  %s4777_s13 = sld [smem:[#allocation33_spill]] (!%p2947_p3) }
  0xd1   : > { %925 = sbr.rel (%p2947_p3) target bundleno = 525 (0x20d), region = 120  ;;  %930 = vadd.xlane.f32.xlu0 (!%p2947_p3), %v926_v0 }
  0xd2   : > { %s4256_s9 = scalar_lea.vmem %s4772_s23, %s3056_s5  ;;  %s4261_s15 = scalar_lea.vmem %s4773_s6, %s2946_s19 }
  0xd3   : > { %s920_s16 = scalar_lea.vmem %s4775_s11, %s4217_s14  ;;  %s4778_s5 = sld [smem:[#allocation34_spill]] (!%p2947_p3) }
  0xd4   : > { %s917_s21 = scalar_lea.vmem %s4774_s27, %s4217_s14 }
  0xd5   : > { %932 = vadd.xlane.f32.xlu0 (!%p2947_p3), %v927_v1 }
  0xd6   : > { %v2948_v17 = vld [vmem:[%s4777_s13] ss:$0 sm:$0xff] (!%p2947_p3) }
  0xd9   : > { %v2949_v19 = vld [vmem:[%s4778_s5] ss:$0 sm:$0xff] }
 0x15e   : > { %v931_v2 = vpop.xlane.xlu0 %930 }
 0x15f   : > { %v935_v3 = vmul.f32 0.0078125, %v931_v2 }
 0x161   : > { %v937_v4 = vsub.f32 %v926_v0, %v935_v3 }
 0x162   : > { %v933_v5 = vpop.xlane.xlu0 %932 }
 0x163   : > { %v936_v6 = vmul.f32 0.0078125, %v933_v5  ;;  %v939_v7 = vmul.f32 %v937_v4, %v937_v4 }
 0x165   : > { %v938_v8 = vsub.f32 %v927_v1, %v936_v6  ;;  %941 = vadd.xlane.f32.xlu1 %v939_v7 }
 0x167   : > { %v940_v9 = vmul.f32 %v938_v8, %v938_v8 }
 0x169   : > { %943 = vadd.xlane.f32.xlu1 %v940_v9 }
 0x1f2   : > { %v942_v10 = vpop.xlane.xlu1 %941 }
 0x1f3   : > { %v945_v11 = vmul.f32 0.0078125, %v942_v10 }
 0x1f5   : > { %v947_v12 = vadd.f32 1e-12, %v945_v11 }
 0x1f6   : > { %v944_v13 = vpop.xlane.xlu1 %943 }
 0x1f7   : > { %3409 = vrsqrt.f32 %v947_v12  ;;  %v946_v14 = vmul.f32 0.0078125, %v944_v13 }
 0x1f9   : > { %v948_v15 = vadd.f32 1e-12, %v946_v14 }
 0x1fb   : > { %3411 = vrsqrt.f32 %v948_v15 }
 0x201   : > { %v3410_v16 = vpop.eup %3409 }
 0x202   : > { %v951_v18 = vmul.f32 %v3410_v16, %v937_v4 }
 0x204   : > { %v959_v20 = vmul.f32 %v2948_v17, %v951_v18 }
 0x205   : > { %v3412_v21 = vpop.eup %3411 }
 0x206   : > { %v967_v22 = vadd.f32 %v2949_v19, %v959_v20  ;;  %v952_v23 = vmul.f32 %v3412_v21, %v938_v8 }
 0x208   : > { %969 = vst [vmem:[#allocation2] sm:$0xff] %v967_v22  ;;  %v960_v24 = vmul.f32 %v2948_v17, %v952_v23 }
 0x20a   : > { %v968_v25 = vadd.f32 %v2949_v19, %v960_v24 }
 0x20c   : > { %970 = vst [vmem:[#allocation2 + $0x8] sm:$0xff] %v968_v25 }
 0x20d PF: > { %v3413_v26 = vld [vmem:[%s4236_s1 + $0x4] ss:$12 sps:$4 sm:$0xff]   ;;  %v3415_v27 = vld [vmem:[%s4236_s1] ss:$12 sps:$4 sm:$0xff]   ;;  %v3815_v28 = vmov 0   ;;  %v3816_v46 = vmov 0.0   ;;  %v1009_v47 = vlaneseq  ;;  %s4781_s27 = scalar_lea.vmem %s4668_s7, %s4217_s14 }
 0x20e   : > { %1184 = vmatprep.mubr.bf16.mxu0 %v3815_v28  ;;  %1152 = vmatprep.subr.bf16.mxu0 %v3413_v26  ;;  %v3416_v29 = vld [vmem:[%s4236_s1 + $0x1c] ss:$12 sps:$4 sm:$0xff]   ;;  %v3418_v30 = vld [vmem:[%s4236_s1 + $0x18] ss:$12 sps:$4 sm:$0xff]   ;;  %v3419_v31 = vld [vmem:[%s4236_s1 + $0x34] ss:$12 sps:$4 sm:$0xff]  }
 0x20f   : > { %1153 = vmatpush1.bf16.msra.mxu0 %v3415_v27  ;;  %v3421_v32 = vld [vmem:[%s4236_s1 + $0x30] ss:$12 sps:$4 sm:$0xff]   ;;  %v3422_v33 = vld [vmem:[%s4236_s1 + $0x4c] ss:$12 sps:$4 sm:$0xff]   ;;  %v3424_v34 = vld [vmem:[%s4236_s1 + $0x48] ss:$12 sps:$4 sm:$0xff]   ;;  %3134 = vmatprep.subr.bf16.mxu1 %v3816_v46 }
 0x210   : > { %1154 = vmatprep.subr.bf16.mxu0 %v3416_v29  ;;  %v3425_v35 = vld [vmem:[%s4236_s1 + $0x64] ss:$12 sps:$4 sm:$0xff]   ;;  %v3427_v36 = vld [vmem:[%s4236_s1 + $0x60] ss:$12 sps:$4 sm:$0xff]   ;;  %v3428_v37 = vld [vmem:[%s4236_s1 + $0x7c] ss:$12 sps:$4 sm:$0xff]  }
 0x211   : > { %v3430_v38 = vld [vmem:[%s4236_s1 + $0x78] ss:$12 sps:$4 sm:$0xff]   ;;  %v3431_v39 = vld [vmem:[%s4236_s1 + $0x94] ss:$12 sps:$4 sm:$0xff]   ;;  %v3433_v40 = vld [vmem:[%s4236_s1 + $0x90] ss:$12 sps:$4 sm:$0xff]  }
 0x212   : > { %v3434_v41 = vld [vmem:[%s4236_s1 + $0xac] ss:$12 sps:$4 sm:$0xff]   ;;  %v3436_v42 = vld [vmem:[%s4236_s1 + $0xa8] ss:$12 sps:$4 sm:$0xff]   ;;  %v4299_v43 = vld [vmem:[#allocation2] sm:$0xff]  ;;  %vm3817_vm0 = vmmov 0  }
 0x213   : > { %1155 = vmatpush1.bf16.msra.mxu0 %v3418_v30  ;;  %v4301_v44 = vld [vmem:[#allocation2 + $0x8] sm:$0xff]  ;;  %3150 = vmatprep.mubr.msk.bf16.mxu1 %vm3817_vm0, %v3816_v46  ;;  %v4314_v48 = vshrl.u32 %v1009_v47, 7  ;;  %v4318_v50 = vld [vmem:[%s4245_s20] sm:$0x7]  ;;  %vm1255_vm1 = vcmask 261120   ;;  %s3818_s20 = smov 96  }
 0x214   : > { %1156 = vmatprep.subr.bf16.mxu0 %v3419_v31  ;;  %v4305_v45 = vpack.c.bf16 %v4301_v44, %v4299_v43  ;;  %v3437_v1 = vld [vmem:[%s4236_s1 + $0x8] ss:$12 sps:$4 sm:$0xff]   ;;  %v3438_v2 = vld [vmem:[%s4236_s1 + $0x20] ss:$12 sps:$4 sm:$0xff]   ;;  %v3439_v3 = vld [vmem:[%s4236_s1 + $0x38] ss:$12 sps:$4 sm:$0xff]  }
 0x215   : > { %v1011_v49 = vsub.s32 0, %v4314_v48  ;;  %v1015_v51 = vsub.s32 1, %v4314_v48  ;;  %3135 = vmatpush3.bf16.msra.mxu1 %v3437_v1  ;;  %v3440_v4 = vld [vmem:[%s4236_s1 + $0x50] ss:$12 sps:$4 sm:$0xff]   ;;  %v3441_v7 = vld [vmem:[%s4236_s1 + $0x68] ss:$12 sps:$4 sm:$0xff]  }
 0x216   : > { %3136 = vmatprep.subr.bf16.mxu1 %v3816_v46  ;;  %v3442_v8 = vld [vmem:[%s4236_s1 + $0x80] ss:$12 sps:$4 sm:$0xff]   ;;  %v3443_v10 = vld [vmem:[%s4236_s1 + $0x98] ss:$12 sps:$4 sm:$0xff]   ;;  %v3444_v11 = vld [vmem:[%s4236_s1 + $0xb0] ss:$12 sps:$4 sm:$0xff]  }
 0x217   : > { %1157 = vmatpush1.bf16.msra.mxu0 %v3421_v32  ;;  %v1012_v52 = vrot.slane %v4318_v50, %v1011_v49  ;;  %v1016_v54 = vrot.slane %v4318_v50, %v1015_v51  ;;  %s4779_s10 = sld [smem:[#allocation31_spill]]  ;;  %vm1313_vm2 = vcmask 130048   ;;  %s3819_s1 = smov 64  }
 0x218   : > { %1158 = vmatprep.subr.bf16.mxu0 %v3422_v33  ;;  %s4783_s26 = sld [smem:[#allocation38_spill]]  ;;  %p3033_p13 = scmp.ne.s32.totalorder %s3791_s3, 1 }
 0x219   : > { %3137 = vmatpush3.bf16.msra.mxu1 %v3438_v2  ;;  %vm3822_vm3 = vmmov (!%p3033_p13), 0   ;;  %s4790_s6 = sld [smem:[#allocation47_spill]] (!%p3033_p13) }
 0x21a   : > { %3138 = vmatprep.subr.bf16.mxu1 %v3816_v46 }
 0x21b   : > { %1159 = vmatpush1.bf16.msra.mxu0 %v3424_v34 }
 0x21c   : > { %1160 = vmatprep.subr.bf16.mxu0 %v3425_v35 }
 0x21d   : > { %3139 = vmatpush3.bf16.msra.mxu1 %v3439_v3  ;;  %s4780_s28 = scalar_lea.vmem %s4779_s10, %s4214_s29  ;;  %s3820_s29 = smov 32  }
 0x21e   : > { %3140 = vmatprep.subr.bf16.mxu1 %v3816_v46  ;;  %v4371_v13 = vld [vmem:[%s4780_s28] ss:$0 sm:$0xff]  ;;  %s4784_s18 = scalar_lea.vmem %s4783_s26, %s4217_s14  ;;  %s4789_s10 = sld [smem:[#allocation45_spill]] (!%p3033_p13) }
 0x21f   : > { %1161 = vmatpush1.bf16.msra.mxu0 %v3427_v36 }
 0x220   : > { %1162 = vmatprep.subr.bf16.mxu0 %v3428_v37 }
 0x221   : > { %3141 = vmatpush3.bf16.msra.mxu1 %v3440_v4 }
 0x222   : > { %3142 = vmatprep.subr.bf16.mxu1 %v3816_v46 }
 0x223   : > { %1163 = vmatpush1.bf16.msra.mxu0 %v3430_v38 }
 0x224   : > { %1164 = vmatprep.subr.bf16.mxu0 %v3431_v39 }
 0x225   : > { %3143 = vmatpush3.bf16.msra.mxu1 %v3441_v7 }
 0x226   : > { %3144 = vmatprep.subr.bf16.mxu1 %v3816_v46 }
 0x227   : > { %1165 = vmatpush1.bf16.msra.mxu0 %v3433_v40  ;;  %v1019_v40 = vsub.s32 2, %v4314_v48 }
 0x228   : > { %1166 = vmatprep.subr.bf16.mxu0 %v3434_v41 }
 0x229   : > { %3145 = vmatpush3.bf16.msra.mxu1 %v3442_v8 }
 0x22a   : > { %3146 = vmatprep.subr.bf16.mxu1 %v3816_v46 }
 0x22b   : > { %1167 = vmatpush1.bf16.msra.mxu0 %v3436_v42 }
 0x22c   : > { %3154 = vmatprep.subr.bf16.mxu0 %v3816_v46 }
 0x22d   : > { %3147 = vmatpush3.bf16.msra.mxu1 %v3443_v10 }
 0x22e   : > { %1185 = vmatmul.mubr.bf16.vlgmr.msra.gmra.mrb[0].mxu0 %v4305_v45  ;;  %3148 = vmatprep.subr.bf16.mxu1 %v3816_v46 }
 0x22f   : > { %3156 = vmatprep.mubr.msk.bf16.mxu0 %vm3817_vm0, %v3816_v46 }
 0x231   : > { %3149 = vmatpush3.bf16.msra.mxu1 %v3444_v11 }
 0x232   : > { %3160 = vmatprep.subr.bf16.mxu1 %v3816_v46 }
 0x234   : > { %3151 = vmatmul.mubr.bf16.vlgmr.msra.gmra.mrb[0].mxu1 %v4305_v45  ;;  %v1020_v45 = vrot.slane %v4318_v50, %v1019_v40 }
 0x235   : > { %3162 = vmatprep.mubr.msk.bf16.mxu1 %vm3817_vm0, %v3816_v46 }
 0x301   : > { %v1186_v53 = vpop.f32.mrb[0].mxu0 }
 0x302   : > { %v1188_v55 = vpop.f32.mrb[1].mxu0  ;;  %v1187_v57 = vadd.f32 %v1186_v53, %v1012_v52 }
 0x303   : > { %v1190_v56 = vpop.f32.mrb[2].mxu0  ;;  %v1189_v60 = vadd.f32 %v1188_v55, %v1016_v54 }
 0x304   : > { %v1191_v58 = vadd.f32 %v1190_v56, %v1012_v52  ;;  %v1192_v59 = vpop.f32.mrb[3].mxu0 }
 0x305   : > { %v1193_v61 = vadd.f32 %v1192_v59, %v1016_v54 }
 0x306   : > { %v4327_v62 = vpack.c.bf16 %v1191_v58, %v1187_v57 }
 0x307   : > { %v4329_v63 = vpack.c.bf16 %v1193_v61, %v1189_v60  ;;  %v1229_v41 = vpop.f32.mrb[0].mxu1 }
 0x308   : > { %v3152_v42 = vpop.f32.mrb[1].mxu1  ;;  %v1230_v53 = vadd.f32 %v1229_v41, %v1020_v45 }
 0x309   : > { %1386 = vrot.lane.b32.xlu0 %v4329_v63, %s3818_s20  ;;  %v1260_v0 = vsel %vm1255_vm1, %v4329_v63, 0  ;;  %v1232_v47 = vpop.f32.mrb[2].mxu1 }
 0x30a   : > { %3155 = vmatpush3.bf16.xpose.msra.mxu0 %v1260_v0  ;;  %v3153_v52 = vpop.f32.mrb[3].mxu1  ;;  %v1233_v54 = vadd.f32 %v1232_v47, %v1020_v45 }
 0x30b   : > { %3166 = vmatprep.subr.bf16.mxu0 %v3816_v46 }
 0x30c   : > { %v4385_v55 = vpack.c.bf16 %v1233_v54, %v1230_v53 }
 0x30d   : > { %1383 = vrot.lane.b32.xlu0 %v4327_v62, %s3818_s20 }
 0x30e   : > { %3161 = vmatpush3.bf16.msra.mxu1 %v4385_v55 }
 0x30f   : > { %3172 = vmatprep.subr.bf16.mxu1 %v3816_v46 }
 0x311   : > { %3157 = vmatmul.mubr.msk.bf16.vlgmr.msra.gmra.mrb[4].mxu0 %vm1255_vm1, %v4327_v62 }
 0x312   : > { %3168 = vmatprep.mubr.msk.bf16.mxu0 %vm3817_vm0, %v3816_v46 }
 0x37b   : > { %v1387_v5 = vpop.permute.xlu0 %1386 }
 0x37c   : > { %v1392_v6 = vsel %vm1255_vm1, %v1387_v5, 0 }
 0x37d   : > { %3167 = vmatpush3.bf16.xpose.msra.mxu0 %v1392_v6 }
 0x37e   : > { %3178 = vmatprep.subr.bf16.mxu0 %v3816_v46 }
 0x37f   : > { %v1384_v9 = vpop.permute.xlu0 %1383 }
 0x384   : > { %3169 = vmatmul.mubr.msk.bf16.vlgmr.msra.gmra.mrb[8].mxu0 %vm1255_vm1, %v1384_v9 }
 0x385   : > { %3182 = vmatprep.mubr.msk.bf16.mxu0 %vm3817_vm0, %v3816_v46 }
 0x3e4   : > { %v1296_v12 = vpop.f32.mrb[4].mxu0 }
 0x3e5   : > { %v1303_v14 = vmul.f32 0.17677669, %v1296_v12  ;;  %v3158_v15 = vpop.f32.mrb[5].mxu0 }
 0x3e6   : > { %v1299_v16 = vpop.f32.mrb[6].mxu0  ;;  %v3447_v15 = vld [vmem:[%s4191_s12 + $0x10] sm:$0xff]  }
 0x3e7   : > { %v1304_v17 = vmul.f32 0.17677669, %v1299_v16  ;;  %v3159_v18 = vpop.f32.mrb[7].mxu0  ;;  %v1311_v19 = vadd.f32 %v4371_v13, %v1303_v14  ;;  %3179 = vmatpush3.bf16.msra.mxu0 %v3447_v15  ;;  %v3448_v16 = vld [vmem:[%s4191_s12 + $0x18] sm:$0xff]  }
 0x3e8   : > { %3180 = vmatprep.subr.bf16.mxu0 %v3816_v46 }
 0x3e9   : > { %v1314_v20 = vsel %vm1313_vm2, %v1311_v19, -inf  ;;  %v1312_v21 = vadd.f32 %v4371_v13, %v1304_v17 }
 0x3ea   : > { %1315 = vmax.xlane.f32.xlu1 %v1314_v20 }
 0x3eb   : > { %v1317_v22 = vsel %vm1313_vm2, %v1312_v21, -inf  ;;  %3181 = vmatpush3.bf16.msra.mxu0 %v3448_v16 }
 0x3ec   : > { %3194 = vmatprep.subr.bf16.mxu0 %v3816_v46 }
 0x3ee   : > { %1318 = vmax.xlane.f32.xlu1 %v1317_v22 }
 0x457   : > { %v1428_v23 = vpop.f32.mrb[8].mxu0 }
 0x458   : > { %v1435_v24 = vmul.f32 0.17677669, %v1428_v23  ;;  %v3170_v25 = vpop.f32.mrb[9].mxu0 }
 0x459   : > { %v1431_v26 = vpop.f32.mrb[10].mxu0 }
 0x45a   : > { %v1436_v27 = vmul.f32 0.17677669, %v1431_v26  ;;  %v3171_v29 = vpop.f32.mrb[11].mxu0  ;;  %v1437_v30 = vadd.f32 %v4371_v13, %v1435_v24  ;;  %v3445_v24 = vld [vmem:[%s4191_s12] sm:$0xff]   ;;  %v3446_v26 = vld [vmem:[%s4191_s12 + $0x8] sm:$0xff]  }
 0x45c   : > { %v1439_v31 = vsel %vm1313_vm2, %v1437_v30, -inf  ;;  %v1438_v32 = vadd.f32 %v4371_v13, %v1436_v27 }
 0x45d   : > { %1440 = vmax.xlane.f32.xlu0 %v1439_v31 }
 0x45e   : > { %v1442_v33 = vsel %vm1313_vm2, %v1438_v32, -inf }
 0x45f   : > { %1443 = vmax.xlane.f32.xlu1 %v1442_v33 }
 0x473   : > { %1625 = vrot.lane.b32.xlu0 %v4329_v63, %s3819_s1 }
 0x477   : > { %v1316_v34 = vpop.xlane.xlu1 %1315 }
 0x478   : > { %v1320_v35 = vsub.f32 %v1311_v19, %v1316_v34 }
 0x47a   : > { %v1322_v36 = vmul.f32 1.442695, %v1320_v35 }
 0x47b   : > { %v1319_v37 = vpop.xlane.xlu1 %1318 }
 0x47c   : > { %3493 = vpow2.f32 %v1322_v36  ;;  %v1321_v38 = vsub.f32 %v1312_v21, %v1319_v37 }
 0x47e   : > { %v1324_v39 = vmul.f32 1.442695, %v1321_v38 }
 0x480   : > { %3495 = vpow2.f32 %v1324_v39 }
 0x486   : > { %v3494_v56 = vpop.eup %3493 }
 0x487   : > { %v1326_v57 = vsel %vm1313_vm2, %v3494_v56, 0.0 }
 0x488   : > { %1327 = vadd.xlane.f32.xlu1 %v1326_v57 }
 0x48a   : > { %v3496_v58 = vpop.eup %3495 }
 0x48b   : > { %v1329_v59 = vsel %vm1313_vm2, %v3496_v58, 0.0 }
 0x48c   : > { %1330 = vadd.xlane.f32.xlu1 %v1329_v59 }
 0x4ea   : > { %v1441_v60 = vpop.xlane.xlu0 %1440 }
 0x4eb   : > { %v1445_v50 = vsub.f32 %v1437_v30, %v1441_v60 }
 0x4ec   : > { %v1444_v61 = vpop.xlane.xlu1 %1443 }
 0x4ed   : > { %v1447_v0 = vmul.f32 1.442695, %v1445_v50  ;;  %v1446_v1 = vsub.f32 %v1438_v32, %v1444_v61 }
 0x4ee   : > { %v1626_v35 = vpop.permute.xlu0 %1625 }
 0x4ef   : > { %3497 = vpow2.f32 %v1447_v0  ;;  %v1449_v2 = vmul.f32 1.442695, %v1446_v1  ;;  %v1631_v39 = vsel %vm1255_vm1, %v1626_v35, 0 }
 0x4f1   : > { %3499 = vpow2.f32 %v1449_v2 }
 0x4f9   : > { %v3498_v3 = vpop.eup %3497 }
 0x4fa   : > { %v1451_v4 = vsel %vm1313_vm2, %v3498_v3, 0.0 }
 0x4fb   : > { %v3500_v5 = vpop.eup %3499  ;;  %1452 = vadd.xlane.f32.xlu1 %v1451_v4 }
 0x4fc   : > { %v1454_v6 = vsel %vm1313_vm2, %v3500_v5, 0.0 }
 0x4ff   : > { %1455 = vadd.xlane.f32.xlu1 %v1454_v6 }
 0x510   : > { %1463 = vrot.lane.b32.xlu1 %v4385_v55, %s3818_s20 }
 0x514   : > { %1623 = vrot.lane.b32.xlu1 %v4327_v62, %s3819_s1 }
 0x515   : > { %v1328_v7 = vpop.xlane.xlu1 %1327 }
 0x516   : > { %3501 = vrcp.f32 %v1328_v7 }
 0x519   : > { %v1331_v8 = vpop.xlane.xlu1 %1330 }
 0x51a   : > { %3503 = vrcp.f32 %v1331_v8 }
 0x520   : > { %v3502_v9 = vpop.eup %3501 }
 0x521   : > { %v1334_v11 = vmul.f32 %v3502_v9, %v3494_v56 }
 0x524   : > { %v3504_v10 = vpop.eup %3503 }
 0x525   : > { %v1335_v12 = vmul.f32 %v3504_v10, %v3496_v58 }
 0x527   : > { %v1336_v14 = vpack.c.bf16 %v1335_v12, %v1334_v11 }
 0x529   : > { %3163 = vmatmul.mubr.msk.bf16.vlgmr.msra.gmra.mrb[4].mxu1 %vm1313_vm2, %v1336_v14 }
 0x52a   : > { %3174 = vmatprep.mubr.msk.bf16.mxu1 %vm3817_vm0, %v3816_v46 }
 0x588   : > { %v1453_v17 = vpop.xlane.xlu1 %1452 }
 0x589   : > { %3505 = vrcp.f32 %v1453_v17 }
 0x58c   : > { %v1456_v18 = vpop.xlane.xlu1 %1455 }
 0x58d   : > { %3507 = vrcp.f32 %v1456_v18  ;;  %v3449_v18 = vld [vmem:[%s4191_s12 + $0x20] sm:$0xff]  }
 0x590   : > { %v1464_v19 = vpop.permute.xlu1 %1463 }
 0x591   : > { %3173 = vmatpush3.bf16.msra.mxu1 %v1464_v19 }
 0x592   : > { %3186 = vmatprep.subr.bf16.mxu1 %v3816_v46 }
 0x593   : > { %v3506_v20 = vpop.eup %3505 }
 0x594   : > { %v1459_v22 = vmul.f32 %v3506_v20, %v3498_v3  ;;  %v1624_v40 = vpop.permute.xlu1 %1623 }
 0x597   : > { %v3508_v21 = vpop.eup %3507 }
 0x598   : > { %v1460_v23 = vmul.f32 %v3508_v21, %v3500_v5 }
 0x59a   : > { %v1461_v25 = vpack.c.bf16 %v1460_v23, %v1459_v22 }
 0x59c   : > { %3175 = vmatmul.mubr.msk.bf16.vlgmr.msra.gmra.mrb[8].mxu1 %vm1313_vm2, %v1461_v25 }
 0x59d   : > { %3187 = vmatpush3.bf16.msra.mxu1 %v3445_v24  ;;  %3190 = vmatprep.mubr.msk.bf16.mxu1 %vm3817_vm0, %v3816_v46 }
 0x59e   : > { %3188 = vmatprep.subr.bf16.mxu1 %v3816_v46 }
 0x5a1   : > { %3189 = vmatpush3.bf16.msra.mxu1 %v3446_v26 }
 0x5a2   : > { %3200 = vmatprep.subr.bf16.mxu1 %v3816_v46 }
 0x5fc   : > { %v1374_v27 = vpop.f32.mrb[4].mxu1 }
 0x5fd   : > { %v3164_v29 = vpop.f32.mrb[5].mxu1 }
 0x5fe   : > { %v1377_v30 = vpop.f32.mrb[6].mxu1 }
 0x5ff   : > { %v1381_v31 = vpack.c.bf16 %v1377_v30, %v1374_v27  ;;  %v3165_v32 = vpop.f32.mrb[7].mxu1  ;;  %v3450_v27 = vld [vmem:[%s4191_s12 + $0x28] sm:$0xff]  }
 0x601   : > { %3191 = vmatmul.mubr.msk.bf16.vlgmr.msra.gmra.mrb[12].mxu1 %vm1255_vm1, %v1381_v31 }
 0x602   : > { %3202 = vmatprep.mubr.msk.bf16.mxu1 %vm3817_vm0, %v3816_v46 }
 0x66f   : > { %v1503_v33 = vpop.f32.mrb[8].mxu1 }
 0x670   : > { %v3176_v34 = vpop.f32.mrb[9].mxu1 }
 0x671   : > { %v1506_v36 = vpop.f32.mrb[10].mxu1 }
 0x672   : > { %v1510_v37 = vpack.c.bf16 %v1506_v36, %v1503_v33  ;;  %v3177_v38 = vpop.f32.mrb[11].mxu1 }
 0x674   : > { %3183 = vmatmul.mubr.msk.bf16.vlgmr.msra.gmra.mrb[12].mxu0 %vm1255_vm1, %v1510_v37 }
 0x675   : > { %3195 = vmatpush3.bf16.xpose.msra.mxu0 %v1631_v39  ;;  %3196 = vmatprep.mubr.msk.bf16.mxu0 %vm3817_vm0, %v3816_v46 }
 0x676   : > { %3206 = vmatprep.subr.bf16.mxu0 %v3816_v46 }
 0x67c   : > { %3197 = vmatmul.mubr.msk.bf16.vlgmr.msra.gmra.mrb[16].mxu0 %vm1255_vm1, %v1624_v40 }
 0x67d   : > { %3210 = vmatprep.mubr.msk.bf16.mxu0 %vm3817_vm0, %v3816_v46  ;;  %3207 = vmatpush3.bf16.msra.mxu0 %v3449_v18 }
 0x67e   : > { %3208 = vmatprep.subr.bf16.mxu0 %v3816_v46 }
 0x681   : > { %3209 = vmatpush3.bf16.msra.mxu0 %v3450_v27  ;;  %v3455_v27 = vld [vmem:[%s4256_s9 + $0x4] ss:$8 sps:$4 sm:$0xff]  }
 0x682   : > { %3220 = vmatprep.subr.bf16.mxu0 %v3816_v46 }
 0x6d4   : > { %v1616_v41 = vpop.f32.mrb[12].mxu1 }
 0x6d5   : > { %v3192_v42 = vpop.f32.mrb[13].mxu1 }
 0x6d6   : > { %v1619_v45 = vpop.f32.mrb[14].mxu1 }
 0x6d7   : > { %v3193_v47 = vpop.f32.mrb[15].mxu1 }
 0x747   : > { %v1560_v52 = vpop.f32.mrb[12].mxu0 }
 0x748   : > { %v4423_v53 = vadd.f32 %v1616_v41, %v1560_v52  ;;  %v3184_v54 = vpop.f32.mrb[13].mxu0 }
 0x749   : > { %v1563_v56 = vpop.f32.mrb[14].mxu0 }
 0x74a   : > { %v4425_v57 = vadd.f32 %v1619_v45, %v1563_v56  ;;  %v3185_v58 = vpop.f32.mrb[15].mxu0 }
 0x74f   : > { %v1667_v59 = vpop.f32.mrb[16].mxu0 }
 0x750   : > { %v1674_v60 = vmul.f32 0.17677669, %v1667_v59  ;;  %v3198_v50 = vpop.f32.mrb[17].mxu0 }
 0x751   : > { %v1670_v61 = vpop.f32.mrb[18].mxu0 }
 0x752   : > { %v1675_v0 = vmul.f32 0.17677669, %v1670_v61  ;;  %v3199_v1 = vpop.f32.mrb[19].mxu0  ;;  %v1676_v2 = vadd.f32 %v4371_v13, %v1674_v60 }
 0x754   : > { %v1678_v3 = vsel %vm1313_vm2, %v1676_v2, -inf  ;;  %v1677_v4 = vadd.f32 %v4371_v13, %v1675_v0 }
 0x755   : > { %1679 = vmax.xlane.f32.xlu1 %v1678_v3 }
 0x756   : > { %v1681_v5 = vsel %vm1313_vm2, %v1677_v4, -inf }
 0x757   : > { %1682 = vmax.xlane.f32.xlu0 %v1681_v5 }
 0x76d   : > { %1701 = vrot.lane.b32.xlu0 %v4385_v55, %s3819_s1 }
 0x7e2   : > { %v1680_v6 = vpop.xlane.xlu1 %1679 }
 0x7e3   : > { %v1684_v7 = vsub.f32 %v1676_v2, %v1680_v6 }
 0x7e4   : > { %v1683_v8 = vpop.xlane.xlu0 %1682 }
 0x7e5   : > { %v1686_v9 = vmul.f32 1.442695, %v1684_v7  ;;  %v1685_v10 = vsub.f32 %v1677_v4, %v1683_v8 }
 0x7e7   : > { %3509 = vpow2.f32 %v1686_v9  ;;  %v1688_v11 = vmul.f32 1.442695, %v1685_v10 }
 0x7e8   : > { %v1702_v12 = vpop.permute.xlu0 %1701 }
 0x7e9   : > { %3511 = vpow2.f32 %v1688_v11  ;;  %3201 = vmatpush3.bf16.msra.mxu1 %v1702_v12 }
 0x7ea   : > { %3214 = vmatprep.subr.bf16.mxu1 %v3816_v46 }
 0x7f1   : > { %v3510_v14 = vpop.eup %3509 }
 0x7f2   : > { %v1690_v15 = vsel %vm1313_vm2, %v3510_v14, 0.0 }
 0x7f3   : > { %v3512_v16 = vpop.eup %3511  ;;  %1691 = vadd.xlane.f32.xlu1 %v1690_v15 }
 0x7f4   : > { %v1693_v17 = vsel %vm1313_vm2, %v3512_v16, 0.0 }
 0x7f7   : > { %1694 = vadd.xlane.f32.xlu1 %v1693_v17 }
 0x808   : > { %1809 = vrot.lane.b32.xlu1 %v4329_v63, %s3820_s29 }
 0x80c   : > { %1807 = vrot.lane.b32.xlu1 %v4327_v62, %s3820_s29 }
 0x880   : > { %v1692_v19 = vpop.xlane.xlu1 %1691 }
 0x881   : > { %3513 = vrcp.f32 %v1692_v19  ;;  %v2995_v19 = vld [vmem:[%s4781_s27] ss:$0 sm:$0xff]  ;;  %s4791_s27 = sld [smem:[#allocation48_spill]] (!%p3033_p13) }
 0x884   : > { %v1695_v20 = vpop.xlane.xlu1 %1694 }
 0x885   : > { %3515 = vrcp.f32 %v1695_v20 }
 0x888   : > { %v1810_v25 = vpop.permute.xlu1 %1809 }
 0x889   : > { %v1815_v63 = vsel %vm1255_vm1, %v1810_v25, 0 }
 0x88b   : > { %v3514_v21 = vpop.eup %3513 }
 0x88c   : > { %v1698_v23 = vmul.f32 %v3514_v21, %v3510_v14  ;;  %v1808_v62 = vpop.permute.xlu1 %1807 }
 0x88f   : > { %v3516_v22 = vpop.eup %3515 }
 0x890   : > { %v1699_v24 = vmul.f32 %v3516_v22, %v3512_v16 }
 0x892   : > { %v1700_v26 = vpack.c.bf16 %v1699_v24, %v1698_v23 }
 0x894   : > { %3203 = vmatmul.mubr.msk.bf16.vlgmr.msra.gmra.mrb[16].mxu1 %vm1313_vm2, %v1700_v26 }
 0x895   : > { %3215 = vmatpush3.bf16.xpose.msra.mxu1 %v1815_v63  ;;  %3216 = vmatprep.mubr.msk.bf16.mxu1 %vm3817_vm0, %v3816_v46 }
 0x896   : > { %3226 = vmatprep.subr.bf16.mxu1 %v3816_v46 }
 0x89c   : > { %3217 = vmatmul.mubr.msk.bf16.vlgmr.msra.gmra.mrb[20].mxu1 %vm1255_vm1, %v1808_v62  ;;  %v3453_v62 = vld [vmem:[%s4256_s9] ss:$8 sps:$4 sm:$0xff]  }
 0x89d   : > { %3230 = vmatprep.mubr.msk.bf16.mxu1 %vm3817_vm0, %v3816_v46 }
 0x967   : > { %v1741_v29 = vpop.f32.mrb[16].mxu1 }
 0x968   : > { %v3204_v30 = vpop.f32.mrb[17].mxu1 }
 0x969   : > { %v1744_v31 = vpop.f32.mrb[18].mxu1  ;;  %v3456_v30 = vld [vmem:[%s4256_s9 + $0x10] ss:$8 sps:$4 sm:$0xff]  }
 0x96a   : > { %v1748_v32 = vpack.c.bf16 %v1744_v31, %v1741_v29  ;;  %v3205_v33 = vpop.f32.mrb[19].mxu1  ;;  %v3458_v29 = vld [vmem:[%s4256_s9 + $0x14] ss:$8 sps:$4 sm:$0xff]  }
 0x96c   : > { %3211 = vmatmul.mubr.msk.bf16.vlgmr.msra.gmra.mrb[20].mxu0 %vm1255_vm1, %v1748_v32 }
 0x96d   : > { %3222 = vmatprep.mubr.msk.bf16.mxu0 %vm3817_vm0, %v3816_v46 }
 0x96f   : > { %v1851_v34 = vpop.f32.mrb[20].mxu1 }
 0x970   : > { %v1858_v35 = vmul.f32 0.17677669, %v1851_v34  ;;  %v3218_v36 = vpop.f32.mrb[21].mxu1 }
 0x971   : > { %v1854_v37 = vpop.f32.mrb[22].mxu1 }
 0x972   : > { %v1859_v38 = vmul.f32 0.17677669, %v1854_v37  ;;  %v3219_v39 = vpop.f32.mrb[23].mxu1  ;;  %v1860_v40 = vadd.f32 %v4371_v13, %v1858_v35  ;;  %v3461_v37 = vld [vmem:[%s4256_s9 + $0x24] ss:$8 sps:$4 sm:$0xff]  }
 0x973   : > { %v3464_v39 = vld [vmem:[%s4256_s9 + $0x34] ss:$8 sps:$4 sm:$0xff]  }
 0x974   : > { %v1862_v41 = vsel %vm1313_vm2, %v1860_v40, -inf  ;;  %v1861_v42 = vadd.f32 %v4371_v13, %v1859_v38  ;;  %v3459_v38 = vld [vmem:[%s4256_s9 + $0x20] ss:$8 sps:$4 sm:$0xff]  }
 0x975   : > { %1863 = vmax.xlane.f32.xlu0 %v1862_v41  ;;  %v3467_v41 = vld [vmem:[%s4256_s9 + $0x44] ss:$8 sps:$4 sm:$0xff]  }
 0x976   : > { %v1865_v45 = vsel %vm1313_vm2, %v1861_v42, -inf }
 0x977   : > { %1866 = vmax.xlane.f32.xlu1 %v1865_v45  ;;  %v3470_v45 = vld [vmem:[%s4256_s9 + $0x54] ss:$8 sps:$4 sm:$0xff]  }
 0x988   : > { %1885 = vrot.lane.b32.xlu1 %v4385_v55, %s3820_s29  ;;  %v3451_v55 = vld [vmem:[%s4191_s12 + $0x30] sm:$0xff]  }
 0x989   : > { %3227 = vmatpush3.bf16.msra.mxu1 %v3451_v55 }
 0x98a   : > { %3228 = vmatprep.subr.bf16.mxu1 %v3816_v46  ;;  %v3452_v46 = vld [vmem:[%s4191_s12 + $0x38] sm:$0xff]  }
 0x98d   : > { %3229 = vmatpush3.bf16.msra.mxu1 %v3452_v46  ;;  %v3480_v46 = vld [vmem:[%s4199_s0 + $0x8] sm:$0xff]  }
 0xa02   : > { %v1864_v47 = vpop.xlane.xlu0 %1863 }
 0xa03   : > { %v1868_v52 = vsub.f32 %v1860_v40, %v1864_v47  ;;  %v3462_v40 = vld [vmem:[%s4256_s9 + $0x30] ss:$8 sps:$4 sm:$0xff]  }
 0xa04   : > { %v1867_v54 = vpop.xlane.xlu1 %1866  ;;  %v3468_v47 = vld [vmem:[%s4256_s9 + $0x50] ss:$8 sps:$4 sm:$0xff]  }
 0xa05   : > { %v1870_v56 = vmul.f32 1.442695, %v1868_v52  ;;  %v1869_v58 = vsub.f32 %v1861_v42, %v1867_v54  ;;  %v3465_v42 = vld [vmem:[%s4256_s9 + $0x40] ss:$8 sps:$4 sm:$0xff]   ;;  %v3473_v52 = vld [vmem:[%s4256_s9 + $0x64] ss:$8 sps:$4 sm:$0xff]  }
 0xa06   : > { %v3471_v54 = vld [vmem:[%s4256_s9 + $0x60] ss:$8 sps:$4 sm:$0xff]  }
 0xa07   : > { %3517 = vpow2.f32 %v1870_v56  ;;  %v1872_v59 = vmul.f32 1.442695, %v1869_v58  ;;  %v3476_v56 = vld [vmem:[%s4256_s9 + $0x74] ss:$8 sps:$4 sm:$0xff]   ;;  %v3474_v58 = vld [vmem:[%s4256_s9 + $0x70] ss:$8 sps:$4 sm:$0xff]   ;;  %s4782_s9 = scalar_lea.vmem %s4669_s8, %s4217_s14 }
 0xa08   : > { %v1886_v60 = vpop.permute.xlu1 %1885 }
 0xa09   : > { %3519 = vpow2.f32 %v1872_v59  ;;  %3221 = vmatpush3.bf16.msra.mxu0 %v1886_v60 }
 0xa0a   : > { %2152 = vmatprep.subr.bf16.mxu0 %v3455_v27 }
 0xa11   : > { %v3518_v50 = vpop.eup %3517 }
 0xa12   : > { %v1874_v13 = vsel %vm1313_vm2, %v3518_v50, 0.0 }
 0xa13   : > { %v3520_v61 = vpop.eup %3519  ;;  %1875 = vadd.xlane.f32.xlu0 %v1874_v13 }
 0xa14   : > { %v1877_v0 = vsel %vm1313_vm2, %v3520_v61, 0.0 }
 0xa17   : > { %1878 = vadd.xlane.f32.xlu0 %v1877_v0 }
 0xa3f   : > { %v1798_v1 = vpop.f32.mrb[20].mxu0 }
 0xa40   : > { %v1805_v2 = vadd.f32 %v1798_v1, %v4423_v53  ;;  %v3212_v3 = vpop.f32.mrb[21].mxu0 }
 0xa41   : > { %v1801_v4 = vpop.f32.mrb[22].mxu0 }
 0xa42   : > { %v1806_v5 = vadd.f32 %v1801_v4, %v4425_v57  ;;  %v3213_v6 = vpop.f32.mrb[23].mxu0 }
 0xa43   : > { %v2997_v6 = vld [vmem:[%s4784_s18] ss:$0 sm:$0xff] }
 0xaa0   : > { %v1876_v7 = vpop.xlane.xlu0 %1875 }
 0xaa1   : > { %3521 = vrcp.f32 %v1876_v7 }
 0xaa4   : > { %v1879_v8 = vpop.xlane.xlu0 %1878 }
 0xaa5   : > { %3523 = vrcp.f32 %v1879_v8 }
 0xaab   : > { %v3522_v9 = vpop.eup %3521 }
 0xaac   : > { %v1882_v11 = vmul.f32 %v3522_v9, %v3518_v50 }
 0xaaf   : > { %v3524_v10 = vpop.eup %3523 }
 0xab0   : > { %v1883_v12 = vmul.f32 %v3524_v10, %v3520_v61 }
 0xab2   : > { %v1884_v14 = vpack.c.bf16 %v1883_v12, %v1882_v11  ;;  %v3477_v11 = vld [vmem:[%s4199_s0 + $0x40] sm:$0xff]  }
 0xab3   : > { %v3478_v12 = vld [vmem:[%s4199_s0] sm:$0xff]   ;;  %3094 = vmatprep.subr.bf16.mxu1 %v3477_v11 }
 0xab4   : > { %3223 = vmatmul.mubr.msk.bf16.vlgmr.msra.gmra.mrb[24].mxu0 %vm1313_vm2, %v1884_v14  ;;  %v3479_v14 = vld [vmem:[%s4199_s0 + $0x48] sm:$0xff]  }
 0xab5   : > { %2184 = vmatprep.mubr.bf16.mxu0 %v3815_v28  ;;  %2153 = vmatpush1.bf16.msra.mxu0 %v3453_v62 }
 0xab6   : > { %2154 = vmatprep.subr.bf16.mxu0 %v3458_v29 }
 0xab9   : > { %2155 = vmatpush1.bf16.msra.mxu0 %v3456_v30 }
 0xaba   : > { %2156 = vmatprep.subr.bf16.mxu0 %v3461_v37 }
 0xabd   : > { %2157 = vmatpush1.bf16.msra.mxu0 %v3459_v38 }
 0xabe   : > { %2158 = vmatprep.subr.bf16.mxu0 %v3464_v39 }
 0xac1   : > { %2159 = vmatpush1.bf16.msra.mxu0 %v3462_v40 }
 0xac2   : > { %2160 = vmatprep.subr.bf16.mxu0 %v3467_v41 }
 0xac5   : > { %2161 = vmatpush1.bf16.msra.mxu0 %v3465_v42 }
 0xac6   : > { %2162 = vmatprep.subr.bf16.mxu0 %v3470_v45 }
 0xac9   : > { %2163 = vmatpush1.bf16.msra.mxu0 %v3468_v47 }
 0xaca   : > { %2164 = vmatprep.subr.bf16.mxu0 %v3473_v52 }
 0xacd   : > { %2165 = vmatpush1.bf16.msra.mxu0 %v3471_v54 }
 0xace   : > { %2166 = vmatprep.subr.bf16.mxu0 %v3476_v56 }
 0xad1   : > { %2167 = vmatpush1.bf16.msra.mxu0 %v3474_v58 }
 0xb87   : > { %v1925_v53 = vpop.f32.mrb[24].mxu0 }
 0xb88   : > { %v3224_v15 = vpop.f32.mrb[25].mxu0 }
 0xb89   : > { %v1928_v57 = vpop.f32.mrb[26].mxu0  ;;  %v3482_v15 = vld [vmem:[%s4199_s0 + $0x10] sm:$0xff]  }
 0xb8a   : > { %v1932_v16 = vpack.c.bf16 %v1928_v57, %v1925_v53  ;;  %v3225_v17 = vpop.f32.mrb[27].mxu0  ;;  %v3481_v53 = vld [vmem:[%s4199_s0 + $0x50] sm:$0xff]   ;;  %v3483_v57 = vld [vmem:[%s4199_s0 + $0x58] sm:$0xff]  }
 0xb8b   : > { %v3485_v17 = vld [vmem:[%s4199_s0 + $0x60] sm:$0xff]  }
 0xb8c   : > { %3231 = vmatmul.mubr.msk.bf16.vlgmr.msra.gmra.mrb[24].mxu1 %vm1255_vm1, %v1932_v16  ;;  %v3484_v16 = vld [vmem:[%s4199_s0 + $0x18] sm:$0xff]  }
 0xb8d   : > { %3095 = vmatpush3.bf16.msra.mxu1 %v3478_v12 }
 0xb8e   : > { %3096 = vmatprep.subr.bf16.mxu1 %v3479_v14 }
 0xb91   : > { %3097 = vmatpush3.bf16.msra.mxu1 %v3480_v46 }
 0xb92   : > { %3098 = vmatprep.subr.bf16.mxu1 %v3481_v53  ;;  %v3014_v53 = vld [vmem:[%s917_s21] ss:$0 sm:$0xff]  ;;  %s4786_s21 = sld [smem:[#allocation30_spill]] }
 0xb95   : > { %3099 = vmatpush3.bf16.msra.mxu1 %v3482_v15 }
 0xb96   : > { %3100 = vmatprep.subr.bf16.mxu1 %v3483_v57 }
 0xb98   : > { %s4788_s20 = scalar_lea.vmem [#allocation8], %s4786_s21 }
 0xb99   : > { %3101 = vmatpush3.bf16.msra.mxu1 %v3484_v16 }
 0xb9a   : > { %3102 = vmatprep.subr.bf16.mxu1 %v3485_v17 }
 0xc5f   : > { %v1982_v18 = vpop.f32.mrb[24].mxu1 }
 0xc60   : > { %v1989_v20 = vadd.f32 %v1982_v18, %v1805_v2  ;;  %v3232_v28 = vpop.f32.mrb[25].mxu1  ;;  %v2996_v2 = vld [vmem:[%s4782_s9] ss:$0 sm:$0xff]  ;;  %v3486_v18 = vld [vmem:[%s4199_s0 + $0x20] sm:$0xff]  }
 0xc61   : > { %v1985_v21 = vpop.f32.mrb[26].mxu1  ;;  %3103 = vmatpush3.bf16.msra.mxu1 %v3486_v18  ;;  %v3489_v28 = vld [vmem:[%s4199_s0 + $0x70] sm:$0xff]  }
 0xc62   : > { %v1998_v22 = vadd.f32 %v2995_v19, %v1989_v20  ;;  %v1990_v23 = vadd.f32 %v1985_v21, %v1806_v5  ;;  %v3233_v24 = vpop.f32.mrb[27].mxu1  ;;  %v3488_v20 = vld [vmem:[%s4199_s0 + $0x28] sm:$0xff]   ;;  %v3490_v21 = vld [vmem:[%s4199_s0 + $0x30] sm:$0xff]  }
 0xc63   : > { %v2060_v24 = vld [vmem:[%s4261_s15] sm:$0x3] }
 0xc64   : > { %v1999_v25 = vadd.f32 %v2995_v19, %v1990_v23  ;;  %v2000_v26 = vadd.f32 %v1998_v22, %v4299_v43  ;;  %v3487_v19 = vld [vmem:[%s4199_s0 + $0x68] sm:$0xff]   ;;  %v3491_v22 = vld [vmem:[%s4199_s0 + $0x78] sm:$0xff]  }
 0xc65   : > { %3104 = vmatprep.subr.bf16.mxu1 %v3487_v19  ;;  %v3492_v23 = vld [vmem:[%s4199_s0 + $0x38] sm:$0xff]  }
 0xc66   : > { %2004 = vadd.xlane.f32.xlu0 %v2000_v26  ;;  %v2001_v63 = vadd.f32 %v1999_v25, %v4301_v44  ;;  %3105 = vmatpush3.bf16.msra.mxu1 %v3488_v20  ;;  %v2065_v25 = vrot.slane %v2060_v24, %v1011_v49 }
 0xc67   : > { %3106 = vmatprep.subr.bf16.mxu1 %v3489_v28 }
 0xc6a   : > { %2006 = vadd.xlane.f32.xlu0 %v2001_v63  ;;  %3107 = vmatpush3.bf16.msra.mxu1 %v3490_v21 }
 0xc6b   : > { %3108 = vmatprep.subr.bf16.mxu1 %v3491_v22 }
 0xc6e   : > { %3109 = vmatpush3.bf16.msra.mxu1 %v3492_v23 }
 0xcf3   : > { %v2005_v31 = vpop.xlane.xlu0 %2004 }
 0xcf4   : > { %v2009_v32 = vmul.f32 0.0078125, %v2005_v31 }
 0xcf6   : > { %v2011_v33 = vsub.f32 %v2000_v26, %v2009_v32  ;;  %v2069_v26 = vrot.slane %v2060_v24, %v1015_v51 }
 0xcf7   : > { %v2007_v43 = vpop.xlane.xlu0 %2006 }
 0xcf8   : > { %v2010_v44 = vmul.f32 0.0078125, %v2007_v43  ;;  %v2013_v34 = vmul.f32 %v2011_v33, %v2011_v33 }
 0xcfa   : > { %v2012_v35 = vsub.f32 %v2001_v63, %v2010_v44  ;;  %2015 = vadd.xlane.f32.xlu0 %v2013_v34 }
 0xcfc   : > { %v2014_v36 = vmul.f32 %v2012_v35, %v2012_v35 }
 0xcfe   : > { %2017 = vadd.xlane.f32.xlu0 %v2014_v36 }
 0xd87   : > { %v2016_v59 = vpop.xlane.xlu0 %2015 }
 0xd88   : > { %v2019_v60 = vmul.f32 0.0078125, %v2016_v59 }
 0xd8a   : > { %v2021_v50 = vadd.f32 1e-12, %v2019_v60 }
 0xd8b   : > { %v2018_v13 = vpop.xlane.xlu0 %2017 }
 0xd8c   : > { %3525 = vrsqrt.f32 %v2021_v50  ;;  %v2020_v61 = vmul.f32 0.0078125, %v2018_v13 }
 0xd8e   : > { %v2022_v0 = vadd.f32 1e-12, %v2020_v61 }
 0xd90   : > { %3527 = vrsqrt.f32 %v2022_v0 }
 0xd96   : > { %v3526_v55 = vpop.eup %3525 }
 0xd97   : > { %v2025_v1 = vmul.f32 %v3526_v55, %v2011_v33 }
 0xd99   : > { %v2033_v5 = vmul.f32 %v2996_v2, %v2025_v1 }
 0xd9a   : > { %v3528_v3 = vpop.eup %3527 }
 0xd9b   : > { %v2026_v4 = vmul.f32 %v3528_v3, %v2012_v35  ;;  %v4504_v8 = vadd.f32 %v2997_v6, %v2033_v5 }
 0xd9d   : > { %v2034_v7 = vmul.f32 %v2996_v2, %v2026_v4 }
 0xd9f   : > { %v4506_v9 = vadd.f32 %v2997_v6, %v2034_v7 }
 0xda1   : > { %v2043_v10 = vpack.c.bf16 %v4506_v9, %v4504_v8 }
 0xda3   : > { %2185 = vmatmul.mubr.bf16.vlgmr.msra.gmra.mrb[28].mxu0 %v2043_v10 }
 0xe76   : > { %v2186_v63 = vpop.f32.mrb[28].mxu0 }
 0xe77   : > { %v2187_v62 = vadd.f32 %v2186_v63, %v2065_v25  ;;  %v2188_v27 = vpop.f32.mrb[29].mxu0 }
 0xe78   : > { %v2189_v29 = vadd.f32 %v2188_v27, %v2069_v26  ;;  %v2190_v30 = vpop.f32.mrb[30].mxu0 }
 0xe79   : > { %v2199_v31 = vmul.f32 0.044715, %v2187_v62  ;;  %v2191_v32 = vadd.f32 %v2190_v30, %v2065_v25  ;;  %v2192_v33 = vpop.f32.mrb[31].mxu0  ;;  %v2195_v55 = vmul.f32 0.5, %v2187_v62 }
 0xe7a   : > { %v2200_v43 = vmul.f32 0.044715, %v2189_v29  ;;  %v2193_v44 = vadd.f32 %v2192_v33, %v2069_v26  ;;  %v2196_v3 = vmul.f32 0.5, %v2189_v29 }
 0xe7b   : > { %v2203_v34 = vmul.f32 %v2199_v31, %v2187_v62  ;;  %v2201_v35 = vmul.f32 0.044715, %v2191_v32  ;;  %v2197_v1 = vmul.f32 0.5, %v2191_v32 }
 0xe7c   : > { %v2204_v36 = vmul.f32 %v2200_v43, %v2189_v29  ;;  %v2202_v37 = vmul.f32 0.044715, %v2193_v44  ;;  %v2198_v4 = vmul.f32 0.5, %v2193_v44  ;;  %v3031_v43 = vld [vmem:[%s920_s16] ss:$0 sm:$0xff] }
 0xe7d   : > { %v2207_v38 = vmul.f32 %v2203_v34, %v2187_v62  ;;  %v2205_v39 = vmul.f32 %v2201_v35, %v2191_v32  ;;  %v3032_v34 = vld [vmem:[%s4788_s20] ss:$0 sm:$0xff] }
 0xe7e   : > { %v2208_v49 = vmul.f32 %v2204_v36, %v2189_v29  ;;  %v2206_v40 = vmul.f32 %v2202_v37, %v2193_v44 }
 0xe7f   : > { %v2211_v48 = vadd.f32 %v2207_v38, %v2187_v62  ;;  %v2209_v51 = vmul.f32 %v2205_v39, %v2191_v32 }
 0xe80   : > { %v2210_v41 = vmul.f32 %v2206_v40, %v2193_v44  ;;  %v2212_v42 = vadd.f32 %v2208_v49, %v2189_v29  ;;  %v3541_v40 = vld [vmem:[%s4789_s10] sm:$0xff] (!%p3033_p13)  }
 0xe81   : > { %v2215_v45 = vmul.f32 0.7978846, %v2211_v48  ;;  %v2213_v47 = vadd.f32 %v2209_v51, %v2191_v32  ;;  %v3821_v48 = vmov (!%p3033_p13), 0.0   ;;  %v3542_v51 = vld [vmem:[%s4789_s10 + $0x8] sm:$0xff] (!%p3033_p13)  }
 0xe82   : > { %v2214_v52 = vadd.f32 %v2210_v41, %v2193_v44  ;;  %v2216_v54 = vmul.f32 0.7978846, %v2212_v42  ;;  %3234 = vmatprep.subr.bf16.mxu0 (!%p3033_p13), %v3821_v48  ;;  %3254 = vmatprep.subr.bf16.mxu1 (!%p3033_p13), %v3821_v48  ;;  %v3543_v41 = vld [vmem:[%s4789_s10 + $0x10] sm:$0xff] (!%p3033_p13)   ;;  %v3549_v42 = vld [vmem:[%s4790_s6] sm:$0xff] (!%p3033_p13)  }
 0xe83   : > { %3529 = vtanh.f32 %v2215_v45  ;;  %v2217_v56 = vmul.f32 0.7978846, %v2213_v47  ;;  %3235 = vmatpush3.bf16.msra.mxu0 (!%p3033_p13), %v3541_v40  ;;  %3250 = vmatprep.mubr.msk.bf16.mxu0 (!%p3033_p13), %vm3822_vm3, %v3821_v48  ;;  %v3544_v45 = vld [vmem:[%s4789_s10 + $0x18] sm:$0xff] (!%p3033_p13)   ;;  %v3550_v47 = vld [vmem:[%s4790_s6 + $0x8] sm:$0xff] (!%p3033_p13)  }
 0xe84   : > { %v2218_v58 = vmul.f32 0.7978846, %v2214_v52  ;;  %3531 = vtanh.f32 %v2216_v54  ;;  %3236 = vmatprep.subr.bf16.mxu0 (!%p3033_p13), %v3821_v48  ;;  %v3545_v52 = vld [vmem:[%s4789_s10 + $0x20] sm:$0xff] (!%p3033_p13)   ;;  %v3551_v54 = vld [vmem:[%s4790_s6 + $0x10] sm:$0xff] (!%p3033_p13)  }
 0xe85   : > { %3533 = vtanh.f32 %v2217_v56  ;;  %v3546_v56 = vld [vmem:[%s4789_s10 + $0x28] sm:$0xff] (!%p3033_p13)  }
 0xe86   : > { %3535 = vtanh.f32 %v2218_v58  ;;  %v3552_v58 = vld [vmem:[%s4790_s6 + $0x18] sm:$0xff] (!%p3033_p13)  }
 0xe87   : > { %3237 = vmatpush3.bf16.msra.mxu0 (!%p3033_p13), %v3542_v51 }
 0xe88   : > { %3238 = vmatprep.subr.bf16.mxu0 (!%p3033_p13), %v3821_v48 }
 0xe8b   : > { %3239 = vmatpush3.bf16.msra.mxu0 (!%p3033_p13), %v3543_v41 }
 0xe8c   : > { %3240 = vmatprep.subr.bf16.mxu0 (!%p3033_p13), %v3821_v48 }
 0xe8d   : > { %v3530_v59 = vpop.eup %3529 }
 0xe8e   : > { %v3532_v60 = vpop.eup %3531  ;;  %v2223_v50 = vadd.f32 1.0, %v3530_v59  ;;  %v3547_v59 = vld [vmem:[%s4789_s10 + $0x30] sm:$0xff] (!%p3033_p13)  }
 0xe8f   : > { %v3534_v13 = vpop.eup %3533  ;;  %v2224_v61 = vadd.f32 1.0, %v3532_v60  ;;  %3241 = vmatpush3.bf16.msra.mxu0 (!%p3033_p13), %v3544_v45  ;;  %v3548_v60 = vld [vmem:[%s4789_s10 + $0x38] sm:$0xff] (!%p3033_p13)  }
 0xe90   : > { %v3536_v0 = vpop.eup %3535  ;;  %v2225_v2 = vadd.f32 1.0, %v3534_v13  ;;  %v2227_v6 = vmul.f32 %v2223_v50, %v2195_v55  ;;  %3242 = vmatprep.subr.bf16.mxu0 (!%p3033_p13), %v3821_v48  ;;  %v3553_v13 = vld [vmem:[%s4790_s6 + $0x20] sm:$0xff] (!%p3033_p13)   ;;  %v3556_v55 = vld [vmem:[%s4790_s6 + $0x38] sm:$0xff] (!%p3033_p13)  }
 0xe91   : > { %v2226_v5 = vadd.f32 1.0, %v3536_v0  ;;  %v2228_v10 = vmul.f32 %v2224_v61, %v2196_v3  ;;  %v3554_v61 = vld [vmem:[%s4790_s6 + $0x28] sm:$0xff] (!%p3033_p13)   ;;  %v3555_v0 = vld [vmem:[%s4790_s6 + $0x30] sm:$0xff] (!%p3033_p13)  }
 0xe92   : > { %v2229_v7 = vmul.f32 %v2225_v2, %v2197_v1  ;;  %v2474_v1 = vld [vmem:[#allocation9] sm:$0x1] (!%p3033_p13) }
 0xe93   : > { %v2230_v11 = vmul.f32 %v2226_v5, %v2198_v4  ;;  %3243 = vmatpush3.bf16.msra.mxu0 (!%p3033_p13), %v3545_v52 }
 0xe94   : > { %v2231_v12 = vpack.c.bf16 %v2229_v7, %v2227_v6  ;;  %3244 = vmatprep.subr.bf16.mxu0 (!%p3033_p13), %v3821_v48 }
 0xe95   : > { %v2232_v14 = vpack.c.bf16 %v2230_v11, %v2228_v10  ;;  %v2581_v11 = vld [vmem:[%s4791_s27] sm:$0x1] (!%p3033_p13) }
 0xe97   : > { %2400 = vmatprep.mubr.bf16.mxu1 %v2232_v14  ;;  %3245 = vmatpush3.bf16.msra.mxu0 (!%p3033_p13), %v3546_v56 }
 0xe98   : > { %2401 = vmatmul.mubr.bf16.vlgmr.msra.gmra.mrb[28].mxu1 %v2231_v12  ;;  %3246 = vmatprep.subr.bf16.mxu0 (!%p3033_p13), %v3821_v48 }
 0xe99   : > { %3270 = vmatprep.mubr.msk.bf16.mxu1 (!%p3033_p13), %vm3822_vm3, %v3821_v48  ;;  %3255 = vmatpush3.bf16.msra.mxu1 (!%p3033_p13), %v3549_v42 }
 0xe9a   : > { %3256 = vmatprep.subr.bf16.mxu1 (!%p3033_p13), %v3821_v48 }
 0xe9b   : > { %3247 = vmatpush3.bf16.msra.mxu0 (!%p3033_p13), %v3547_v59 }
 0xe9c   : > { %3248 = vmatprep.subr.bf16.mxu0 (!%p3033_p13), %v3821_v48 }
 0xe9d   : > { %3257 = vmatpush3.bf16.msra.mxu1 (!%p3033_p13), %v3550_v47 }
 0xe9e   : > { %3258 = vmatprep.subr.bf16.mxu1 (!%p3033_p13), %v3821_v48 }
 0xe9f   : > { %3249 = vmatpush3.bf16.msra.mxu0 (!%p3033_p13), %v3548_v60 }
 0xea1   : > { %3259 = vmatpush3.bf16.msra.mxu1 (!%p3033_p13), %v3551_v54 }
 0xea2   : > { %3260 = vmatprep.subr.bf16.mxu1 (!%p3033_p13), %v3821_v48 }
 0xea5   : > { %3261 = vmatpush3.bf16.msra.mxu1 (!%p3033_p13), %v3552_v58 }
 0xea6   : > { %3262 = vmatprep.subr.bf16.mxu1 (!%p3033_p13), %v3821_v48 }
 0xea9   : > { %3263 = vmatpush3.bf16.msra.mxu1 (!%p3033_p13), %v3553_v13 }
 0xeaa   : > { %3264 = vmatprep.subr.bf16.mxu1 (!%p3033_p13), %v3821_v48 }
 0xead   : > { %3265 = vmatpush3.bf16.msra.mxu1 (!%p3033_p13), %v3554_v61 }
 0xeae   : > { %3266 = vmatprep.subr.bf16.mxu1 (!%p3033_p13), %v3821_v48 }
 0xeb1   : > { %3267 = vmatpush3.bf16.msra.mxu1 (!%p3033_p13), %v3555_v0 }
 0xeb2   : > { %3268 = vmatprep.subr.bf16.mxu1 (!%p3033_p13), %v3821_v48 }
 0xeb5   : > { %3269 = vmatpush3.bf16.msra.mxu1 (!%p3033_p13), %v3556_v55 }
 0xf6b   : > { %v3110_v46 = vpop.f32.mrb[28].mxu1 }
 0xf6c   : > { %v3111_v15 = vpop.f32.mrb[29].mxu1 }
 0xf6d   : > { %v3112_v57 = vadd.f32 %v3111_v15, %v3110_v46  ;;  %v3113_v16 = vpop.f32.mrb[30].mxu1 }
 0xf6e   : > { %v3114_v17 = vpop.f32.mrb[31].mxu1 }
 0xf6f   : > { %v2403_v18 = vadd.f32 %v3112_v57, %v3014_v53  ;;  %v3115_v19 = vadd.f32 %v3114_v17, %v3113_v16 }
 0xf71   : > { %v2406_v20 = vadd.f32 %v3115_v19, %v3014_v53  ;;  %v2409_v28 = vadd.f32 %v2403_v18, %v4504_v8 }
 0xf73   : > { %2413 = vadd.xlane.f32.xlu1 %v2409_v28  ;;  %v2410_v21 = vadd.f32 %v2406_v20, %v4506_v9 }
 0xf75   : > { %2415 = vadd.xlane.f32.xlu0 %v2410_v21 }
0x1000   : > { %v2414_v22 = vpop.xlane.xlu1 %2413 }
0x1001   : > { %v2417_v23 = vmul.f32 0.0078125, %v2414_v22 }
0x1002   : > { %v2416_v24 = vpop.xlane.xlu0 %2415 }
0x1003   : > { %v2419_v25 = vsub.f32 %v2409_v28, %v2417_v23  ;;  %v2418_v26 = vmul.f32 0.0078125, %v2416_v24 }
0x1005   : > { %v2420_v63 = vsub.f32 %v2410_v21, %v2418_v26  ;;  %v2421_v62 = vmul.f32 %v2419_v25, %v2419_v25 }
0x1007   : > { %2423 = vadd.xlane.f32.xlu0 %v2421_v62  ;;  %v2422_v27 = vmul.f32 %v2420_v63, %v2420_v63 }
0x100b   : > { %2425 = vadd.xlane.f32.xlu0 %v2422_v27 }
0x1094   : > { %v2424_v29 = vpop.xlane.xlu0 %2423 }
0x1095   : > { %v2427_v30 = vmul.f32 0.0078125, %v2424_v29 }
0x1097   : > { %v2429_v31 = vadd.f32 1e-12, %v2427_v30 }
0x1098   : > { %v2426_v8 = vpop.xlane.xlu0 %2425 }
0x1099   : > { %3537 = vrsqrt.f32 %v2429_v31  ;;  %v2428_v32 = vmul.f32 0.0078125, %v2426_v8 }
0x109b   : > { %v2430_v9 = vadd.f32 1e-12, %v2428_v32 }
0x109d   : > { %3539 = vrsqrt.f32 %v2430_v9 }
0x10a3   : > { %v3538_v33 = vpop.eup %3537 }
0x10a4   : > { %v2433_v44 = vmul.f32 %v3538_v33, %v2419_v25 }
0x10a6   : > { %v2441_v35 = vmul.f32 %v3031_v43, %v2433_v44 }
0x10a7   : > { %v3540_v36 = vpop.eup %3539 }
0x10a8   : > { %v2449_v37 = vadd.f32 %v3032_v34, %v2441_v35  ;;  %v2434_v38 = vmul.f32 %v3540_v36, %v2420_v63  ;;  %2456 = sbr.rel (%p3033_p13) target bundleno = 4710 (0x1266), region = 124 }
0x10aa   : > { %2451 = vst [vmem:[#allocation2] sm:$0xff] %v2449_v37  ;;  %v2442_v39 = vmul.f32 %v3031_v43, %v2434_v38  ;;  %v2457_v50 = vpack.c.bf16 (!%p3033_p13), %v2449_v37, %v2449_v37 }
0x10ac   : > { %v2450_v49 = vadd.f32 %v3032_v34, %v2442_v39  ;;  %3251 = vmatmul.mubr.bf16.vlgmr.msra.gmra.mrb[0].mxu0 (!%p3033_p13), %v2457_v50 }
0x10ae   : > { %2452 = vst [vmem:[#allocation2 + $0x8] sm:$0xff] %v2450_v49 }
0x117f   : > { %v2557_v2 = vpop.f32.mrb[0].mxu0 }
0x1180   : > { %v2558_v3 = vadd.f32 %v2557_v2, %v2474_v1  ;;  %v3252_v4 = vpop.f32.mrb[1].mxu0 }
0x1181   : > { %v2560_v5 = vpop.f32.mrb[2].mxu0 }
0x1182   : > { %3557 = vtanh.f32 %v2558_v3  ;;  %v3253_v6 = vpop.f32.mrb[3].mxu0 }
0x118c   : > { %v3558_v7 = vpop.eup %3557 }
0x118d   : > { %v2564_v10 = vpack.c.bf16 %v3558_v7, %v3558_v7 }
0x118f   : > { %3271 = vmatmul.mubr.bf16.vlgmr.msra.gmra.mrb[0].mxu1 %v2564_v10 }
0x1262   : > { %v2664_v12 = vpop.f32.mrb[0].mxu1 }
0x1263   : > { %v2665_v14 = vadd.f32 %v2664_v12, %v2581_v11  ;;  %v3272_v46 = vpop.f32.mrb[1].mxu1 }
0x1264   : > { %v2667_v53 = vpop.f32.mrb[2].mxu1 }
0x1265   : > { %2670 = vst [vmem:[%s4273_s2] sm:$0x1] %v2665_v14  ;;  %v3273_v15 = vpop.f32.mrb[3].mxu1 }
0x1266 PF: > { %s4792_s12 = sld [smem:[#allocation20_spill]]  ;;  %s4793_s25 = sld [smem:[#allocation27_spill]] }
0x1267   : > { %s4794_s26 = sld [smem:[#allocation49_spill]]  ;;  %s2684_s15 = sshll.u32 %s4273_s2, 4  ;;  %s2685_s15 = int_to_ptr.vmem [resolvable:$true] %s2684_s15 }
0x1268   : > { %s4796_s13 = sand.u32 1, %s3771_s22   ;;  %s3677_s30 = scalar_lea.vmem %s2685_s15, 16 }
0x1269   : > { %s2672_s21 = scalar_lea.sflag [#allocation5], %s4796_s13  ;;  %p3678_p5 = scmp.ne.s32.totalorder %s2685_s15, %s3677_s30 }
0x126a   : > { %s3823_s4 = smov [#allocation11]  }
0x126b   : > { %s3681_s5 = sshll.u32 %s3823_s4, 4  ;;  %s3682_s5 = int_to_ptr.vmem [resolvable:$false] %s3681_s5 }
0x126c   : > { %s3050_s9 = sshll.u32 %s4792_s12, 4  ;;  %p4797_p6 = scmp.ne.s32.totalorder %s4793_s25, 0 }
0x126d   : > { %s4795_s18 = smov %s4794_s26  ;;  %s4602_s0 = scalar_lea.hbm %s4794_s26, %s3050_s9 }
0x126e   : > { %p3679_p8 = pnand %p3678_p5, %p4797_p6  ;;  %s3683_s20 = scalar_lea.vmem %s3682_s5, 32 }
0x126f   : > { %p3684_p7 = scmp.lt.s32.totalorder %s2685_s15, %s3682_s5  ;;  %p3685_p9 = scmp.lt.s32.totalorder %s3683_s20, %s3677_s30 }
0x1270   : > { %p3680_p11 = pneg %p3679_p8 }
0x1271   : > { %p3686_p1 = por %p3685_p9, %p3684_p7 }
0x1273   : > { %p3687_p12 = pnand %p3686_p1, %p3680_p11 }
0x1275   : > { %3690 = shalt.err (!%p3687_p12)
}
0x1276   : > { %s3691_s2 = scalar_lea.hbm %s4602_s0, 16  ;;  %s3695_s14 = scalar_lea.hbm %s4795_s18, 32 }
0x1277   : > { %p3692_p2 = scmp.ne.s32.totalorder %s4602_s0, %s3691_s2  ;;  %p3696_p10 = scmp.lt.u32.totalorder %s4602_s0, %s4795_s18 }
0x1278   : > { %p3697_p3 = scmp.lt.u32.totalorder %s3695_s14, %s3691_s2  ;;  %p3699_p5 = scmp.lt.u32.totalorder %s3691_s2, %s4602_s0 }
0x1279   : > { %p3693_p4 = pnand %p3692_p2, %p4797_p6 }
0x127a   : > { %p3698_p13 = por %p3697_p3, %p3696_p10 }
0x127b   : > { %p3694_p0 = pneg %p3693_p4 }
0x127c   : > { %p3700_p8 = por %p3699_p5, %p3698_p13 }
0x127e   : > { %p3701_p11 = pnand %p3700_p8, %p3694_p0 }
0x1280   : > { %3704 = shalt.err (!%p3701_p11)
}
0x1281   : > { %3286 = dma.vmem_to_hbm [thread:$0]  (%p4797_p6), %s2685_s15, 16, %s4602_s0, %s2672_s21  }
0x1282 PF: > { %s4798_s3 = sld [smem:[#allocation23_spill]]  ;;  %s4799_s1 = sld [smem:[#allocation16_spill]] }
0x1283   : > { %s4800_s29 = sld [smem:[#allocation28_spill]] }
0x1288   : > { %p3309_p7 = scmp.ge.s32.totalorder %s4798_s3, 2  ;;  %s2696_s17 = sand.u32 1, %s4799_s1  }
0x1289   : > { %p4801_p9 = scmp.ne.s32.totalorder %s4800_s29, 0  ;;  %s2697_s27 = scalar_lea.sflag [#allocation5], %s2696_s17 }
0x128b   : > { %p3303_p1 = pnand %p3309_p7, %p4801_p9 }
0x128d   : > { %3762 = dma.done.wait (!%p3303_p1), %s2697_s27, 16  }
0x128e   : > { %3764 = vsyncadd (!%p3303_p1), %s2697_s27, 4294967280  ;;  %s40_s4 = sadd.s32 1, %s4798_s3   ;;  %s4802_s12 = sld [smem:[#allocation17_spill]] }
0x128f   : > { %p37_p12 = scmp.ge.s32.totalorder %s40_s4, 6   ;;  %s4803_s23 = sld [smem:[#allocation29_spill]] }
0x1290   : > { %s4804_s24 = sld [smem:[#allocation18_spill]]  ;;  %s4805_s2 = sld [smem:[#allocation19_spill]] }
0x1291   : > { %s4806_s25 = sld [smem:[#allocation25_spill]]  ;;  %s4807_s3 = sld [smem:[#allocation21_spill]] }
0x1292   : > { %s4808_s26 = sld [smem:[#allocation22_spill]]  ;;  %s4809_s27 = sld [smem:[#allocation24_spill]] }
0x1293   : > { %s4810_s28 = sld [smem:[#allocation26_spill]]  ;;  %s4811_s1 = smov %s3771_s22 }
0x1294   : > { %s4812_s22 = smov %s4802_s12  ;;  %39 = sbr.rel (!%p37_p12) target bundleno = 32 (0x20), region = 214 }
0x129b   :  { %2701 = vsyncpa [#allocation4], 1 }
0x129c   :  { %2703 = vsyncpa [#allocation4 + $0x1], 1 }
0x129d   :  { %2704 = vsyncpa [#allocation7], 1 }
0x129e   :  { %2706 = vsyncpa [#allocation7 + $0x1], 1 }
0x129f   :  { %2707 = vsyncpa [#allocation10], 1 }
0x12a0   :  { %2708 = vsyncpa [#allocation5], 1 }
0x12a1   :  { %2710 = vsyncpa [#allocation5 + $0x1], 1 }

</bundles_post_ra>
